<compile_context>
chip_gen: v7x
topology: tpu7x:2x2x1
jax: 0.10.0
libtpu: 0.0.40
codegen_flags: <defaults>
</compile_context>

<pallas_src>
import functools

import jax
import jax.numpy as jnp
from jax.experimental import pallas as pl
from jax.experimental.pallas import tpu as pltpu

# ----------------------------- configuration --------------------------------
NB_NODES = 3            # args.nb_nodes
NODE_DIM = 128          # args.node_dim
N_VERTS = 64            # graph vertices per graph
N_GRAPHS = 8            # graphs in the batch (grid=(2,) -> both v7x TCs used)
GRAPHS_PER_BLOCK = 4    # graphs per grid step -> block-diag matmul M = K = 256
LEAKY_SLOPE = 0.2       # args.leaky_slope
BN_EPS = 1e-5

# Synthetic genotype (same structure as GNAS-MP genotypes).
GENOTYPE = {
    "topology": [
        {"src": 0, "dst": 1, "ops": "V_I"},
        {"src": 0, "dst": 2, "ops": "V_Sum"},
        {"src": 1, "dst": 2, "ops": "V_I"},
        {"src": 0, "dst": 3, "ops": "V_Mean"},
        {"src": 2, "dst": 3, "ops": "V_Sum"},
    ]
}
# Ops WITHOUT a V_Package Linear+BN wrapper (mirrors V_Package in GNAS-MP).
_PASSTHROUGH_OPS = ("V_I", "V_None")
_AGG_OPS = ("V_Sum", "V_Mean")


def _num_packages(topology):
    return sum(1 for e in topology if e["ops"] not in _PASSTHROUGH_OPS)


# ------------------------------ Pallas kernel --------------------------------
def cell_kernel(
    adj_ref,      # [1, M, M]   bf16 block-diagonal adjacency (0/1, exact in bf16)
    v_ref,        # [M, D]      f32 input node features (V_in)
    invdeg_ref,   # [M, 1]      f32 exact 1/max(in-degree, 1) (host-precomputed)
    wp_ref,       # [P, D, D]   bf16 per-package Linear weight, eval-BN folded in
    bp_ref,       # [P, D]      f32 per-package bias, eval-BN folded in
    wc_ref,       # [nb*D, D]   bf16 trans_concat_V weight, batchnorm_V folded in
    bc_ref,       # [1, D]      f32 trans_concat_V bias, batchnorm_V folded in
    out_ref,      # [M, D]      f32 output node features
    *,
    topology,
    nb_nodes,
    leaky_slope,
    node_dim,
):
    d = node_dim

    v_in = v_ref[...]                              # [M, D] f32
    v_in_bf = v_in.astype(jnp.bfloat16)            # cast once, reuse everywhere
    adj_bf = adj_ref[0]                            # [M, M] bf16 block-diag

    has_mean = any(e["ops"] == "V_Mean" for e in topology)
    if has_mean:
        inv_deg = invdeg_ref[...]                  # [M, 1] f32 (exact, host-side)

    # Static DAG unroll (topology is Python data, not traced values).
    link = {}
    for edge in topology:
        link.setdefault(edge["dst"], []).append((edge["src"], edge["ops"]))

    states_f32 = [v_in]
    states_bf16 = [v_in_bf]
    agg_cache = {}       # src index -> adj_bd @ states[src]  (CSE across edges)
    acc = None           # running trans_concat_V accumulator (f32 [M, D])
    pkg = 0
    for dst in range(1, nb_nodes + 1):
        agg = None
        for src, op in link.get(dst, []):
            if op == "V_None":
                continue                            # zero contribution
            if op == "V_I":
                out = states_f32[src]
            elif op in _AGG_OPS:
                if src not in agg_cache:
                    # Block-diagonal aggregation: one MXU-filling [M,M]@[M,D].
                    agg_cache[src] = jnp.dot(
                        adj_bf, states_bf16[src],
                        preferred_element_type=jnp.float32,
                    )
                out = agg_cache[src]
                if op == "V_Mean":
                    out = out * inv_deg
            else:
                raise NotImplementedError(f"op {op} not supported in kernel")
            if op not in _PASSTHROUGH_OPS:
                # V_Package: Linear(node_dim, node_dim) with eval-BN folded in.
                out = (
                    jnp.dot(
                        out.astype(jnp.bfloat16),
                        wp_ref[pkg],
                        preferred_element_type=jnp.float32,
                    )
                    + bp_ref[pkg]
                )
                pkg += 1
            agg = out if agg is None else agg + out
        if agg is None:
            agg = jnp.zeros_like(v_in)
        agg_bf = agg.astype(jnp.bfloat16)           # cast once per state
        states_f32.append(agg)
        states_bf16.append(agg_bf)
        # Accumulate trans_concat_V contribution as-we-go (K split into D-chunks)
        # instead of materializing a [M, nb*D] concat slab in VMEM.
        contrib = jnp.dot(
            agg_bf,
            wc_ref[(dst - 1) * d: dst * d, :],
            preferred_element_type=jnp.float32,
        )
        acc = contrib if acc is None else acc + contrib

    # trans_concat_V bias (batchnorm_V folded) + LeakyReLU + residual.
    v = acc + bc_ref[...]
    v = jnp.where(v >= 0.0, v, leaky_slope * v)
    # TODO(synk): dropout is eval-mode identity; training-mode RNG dropout and
    #             batch-statistics BatchNorm are not implemented here.
    out_ref[...] = (v + v_in).astype(out_ref.dtype)


# ------------------------------ host helpers ---------------------------------
def build_block_diag_adj(adj, graphs_per_block):
    """[B, N, N] per-graph adjacency -> [B/GPB, GPB*N, GPB*N] block-diagonal."""
    b, n, _ = adj.shape
    nb = b // graphs_per_block
    adj_r = adj.reshape(nb, graphs_per_block, n, n)
    eye = jnp.eye(graphs_per_block, dtype=adj.dtype)                  # 0/1, exact
    bd = adj_r[:, :, :, None, :] * eye[None, :, None, :, None]
    return bd.reshape(nb, graphs_per_block * n, graphs_per_block * n)


def cell_forward(
    adj,          # [B, N, N] bf16 adjacency (A[b, i, j] = 1 iff edge j -> i)
    v_in,         # [B*N, D]  f32 node features
    folded,       # BN-folded, bf16-cast params (see fold_eval_bn)
    *,
    topology,
    nb_nodes,
    leaky_slope,
    graphs_per_block=GRAPHS_PER_BLOCK,
):
    b_graphs, n, _ = adj.shape
    m_total, d = v_in.shape
    assert m_total == b_graphs * n
    assert b_graphs % graphs_per_block == 0
    num_blocks = b_graphs // graphs_per_block
    grid = (num_blocks,)
    m_blk = graphs_per_block * n

    # Host-side prep: block-diagonal adjacency + exact 1/in-degree.
    adj_bd = build_block_diag_adj(adj, graphs_per_block)   # [num_blocks, M, M]
    deg = adj.astype(jnp.float32).sum(axis=2).reshape(m_total, 1)
    inv_deg = 1.0 / jnp.maximum(deg, 1.0)                   # [B*N, 1] f32, exact

    wp, bp, wc, bc = folded["Wp"], folded["bp"], folded["Wc"], folded["bc"]
    n_pkg = wp.shape[0]

    kernel = functools.partial(
        cell_kernel,
        topology=topology,
        nb_nodes=nb_nodes,
        leaky_slope=leaky_slope,
        node_dim=d,
    )

    # Advisory cost estimate for XLA's scheduler.
    n_agg_srcs = len({e["src"] for e in topology if e["ops"] in _AGG_OPS})
    flops = (
        n_agg_srcs * 2 * num_blocks * m_blk * m_blk * d    # block-diag aggregations
        + n_pkg * 2 * m_total * d * d                      # package Linears
        + 2 * m_total * (nb_nodes * d) * d                 # trans_concat_V
    )
    bytes_accessed = (
        adj_bd.nbytes + v_in.nbytes + inv_deg.nbytes + m_total * d * 4
        + wp.nbytes + bp.nbytes + wc.nbytes + bc.nbytes
    )
    cost = pl.CostEstimate(
        flops=int(flops), transcendentals=0, bytes_accessed=int(bytes_accessed)
    )

    in_specs = [
        # Per-grid-step blocks (double-buffered across the parallel grid).
        pl.BlockSpec((1, m_blk, m_blk), lambda i: (i, 0, 0)),
        pl.BlockSpec((m_blk, d), lambda i: (i, 0)),
        pl.BlockSpec((m_blk, 1), lambda i: (i, 0)),
        # Weights: constant index_map -> VMEM-resident across grid iterations.
        pl.BlockSpec(wp.shape, lambda i: (0, 0, 0)),
        pl.BlockSpec(bp.shape, lambda i: (0, 0)),
        pl.BlockSpec(wc.shape, lambda i: (0, 0)),
        pl.BlockSpec(bc.shape, lambda i: (0, 0)),
    ]
    out_spec = pl.BlockSpec((m_blk, d), lambda i: (i, 0))

    return pl.pallas_call(
        kernel,
        grid=grid,
        in_specs=in_specs,
        out_specs=out_spec,
        out_shape=jax.ShapeDtypeStruct((m_total, d), jnp.float32),
        compiler_params=pltpu.CompilerParams(
            dimension_semantics=("parallel",),
        ),
        cost_estimate=cost,
    )(adj_bd, v_in, inv_deg, wp, bp, wc, bc)


# --------------------------- parameter handling ------------------------------
def init_params(key, topology, nb_nodes, node_dim):
    """Deterministic synthetic parameters (shapes follow the PyTorch module)."""
    n_pkg = _num_packages(topology)
    k = jax.random.split(key, 4)
    d = node_dim
    return {
        # V_Package Linear weights stored as [in, out] (equivalent to torch W.T).
        "Wp": jax.random.normal(k[0], (n_pkg, d, d), jnp.float32) / jnp.sqrt(d),
        "bp": 0.01 * jax.random.normal(k[1], (n_pkg, 1, d), jnp.float32),
        # V_Package BatchNorm1d defaults.
        "gp": jnp.ones((n_pkg, 1, d), jnp.float32),
        "betap": jnp.zeros((n_pkg, 1, d), jnp.float32),
        "mup": jnp.zeros((n_pkg, 1, d), jnp.float32),
        "varp": jnp.ones((n_pkg, 1, d), jnp.float32),
        # trans_concat_V: Linear(nb_nodes*d -> d), stored as [in, out].
        "Wc": jax.random.normal(k[2], (nb_nodes * d, d), jnp.float32)
        / jnp.sqrt(nb_nodes * d),
        "bc": 0.01 * jax.random.normal(k[3], (1, d), jnp.float32),
        # batchnorm_V defaults.
        "gV": jnp.ones((1, d), jnp.float32),
        "betaV": jnp.zeros((1, d), jnp.float32),
        "muV": jnp.zeros((1, d), jnp.float32),
        "varV": jnp.ones((1, d), jnp.float32),
    }


def fold_eval_bn(p):
    """Fold eval-mode BatchNorm into the preceding Linear (pure affine fold)."""
    scale_p = p["gp"] * jax.lax.rsqrt(p["varp"] + BN_EPS)          # [P, 1, D]
    wp_f = p["Wp"] * scale_p                                       # scale output cols
    bp_f = (p["bp"] - p["mup"]) * scale_p + p["betap"]             # [P, 1, D]
    scale_v = p["gV"] * jax.lax.rsqrt(p["varV"] + BN_EPS)          # [1, D]
    wc_f = p["Wc"] * scale_v
    bc_f = (p["bc"] - p["muV"]) * scale_v + p["betaV"]
    n_pkg, _, d = bp_f.shape
    return {
        "Wp": wp_f.astype(jnp.bfloat16),
        "bp": bp_f.reshape(n_pkg, d).astype(jnp.float32),          # flat [P, D]
        "Wc": wc_f.astype(jnp.bfloat16),
        "bc": bc_f.astype(jnp.float32),
    }


# ------------------------- pure-JAX f32 reference -----------------------------
def cell_reference(adj_f32, v_in_flat, p, *, topology, nb_nodes, leaky_slope):
    b, n, _ = adj_f32.shape
    d = v_in_flat.shape[1]
    v_in = v_in_flat.reshape(b, n, d)
    deg = adj_f32.sum(axis=2, keepdims=True)
    inv_deg = 1.0 / jnp.maximum(deg, 1.0)

    def bn(x, gamma, beta, mean, var):
        return gamma * (x - mean) / jnp.sqrt(var + BN_EPS) + beta

    link = {}
    for e in topology:
        link.setdefault(e["dst"], []).append((e["src"], e["ops"]))

    states = [v_in]
    pkg = 0
    for dst in range(1, nb_nodes + 1):
        agg = jnp.zeros_like(v_in)
        for src, op in link.get(dst, []):
            h = states[src]
            if op == "V_None":
                out = jnp.zeros_like(h)
            elif op == "V_I":
                out = h
            else:
                out = jnp.einsum("bij,bjd->bid", adj_f32, h)
                if op == "V_Mean":
                    out = out * inv_deg
            if op not in _PASSTHROUGH_OPS:
                out = out @ p["Wp"][pkg] + p["bp"][pkg]
                out = bn(out, p["gp"][pkg], p["betap"][pkg], p["mup"][pkg], p["varp"][pkg])
                pkg += 1
            agg = agg + out
        states.append(agg)

    cat = jnp.concatenate(states[1:], axis=2)        # [B, N, nb*D]
    v = cat @ p["Wc"] + p["bc"]
    v = bn(v, p["gV"], p["betaV"], p["muV"], p["varV"])
    v = jnp.where(v >= 0.0, v, leaky_slope * v)
    v = v + v_in
    return v.reshape(b * n, d)


# --------------------------------- main ---------------------------------------
if __name__ == "__main__":
    key = jax.random.PRNGKey(0)
    k_v, k_a, k_p = jax.random.split(key, 3)

    # Node features V_in: [B*N, D]  (rows of all graphs stacked -> big matmul M)
    v_in = jax.random.normal(k_v, (N_GRAPHS * N_VERTS, NODE_DIM), jnp.float32)
    # Dense adjacency A: [B, N, N], A[b, i, j] = 1 iff edge j -> i.  bf16 is exact.
    adj = (
        jax.random.uniform(k_a, (N_GRAPHS, N_VERTS, N_VERTS)) < 0.1
    ).astype(jnp.bfloat16)

    raw_params = init_params(k_p, GENOTYPE["topology"], NB_NODES, NODE_DIM)
    folded_params = fold_eval_bn(raw_params)

    out = cell_forward(
        adj,
        v_in,
        folded_params,
        topology=GENOTYPE["topology"],
        nb_nodes=NB_NODES,
        leaky_slope=LEAKY_SLOPE,
    )
    out = jax.block_until_ready(out)
    assert out.shape == (N_GRAPHS * N_VERTS, NODE_DIM) and out.dtype == jnp.float32

    # Loose tolerance check vs the pure-f32 reference (bf16 MXU inputs, f32 acc).
    ref = cell_reference(
        adj.astype(jnp.float32),
        v_in,
        raw_params,
        topology=GENOTYPE["topology"],
        nb_nodes=NB_NODES,
        leaky_slope=LEAKY_SLOPE,
    )
    rel_err = float(jnp.max(jnp.abs(out - ref)) / (jnp.max(jnp.abs(ref)) + 1e-6))
    assert rel_err < 5e-2, f"max relative error too large: {rel_err}"

    print("KERNEL_OK")
</pallas_src>

<mosaic_0001>
module attributes {stable_mosaic.version = 11 : i64} {
  func.func @cell_kernel(%arg0: i32, %arg1: memref<1x256x256xbf16, #tpu.memory_space<vmem>>, %arg2: memref<256x128xf32, #tpu.memory_space<vmem>>, %arg3: memref<256x1xf32, #tpu.memory_space<vmem>>, %arg4: memref<3x128x128xbf16, #tpu.memory_space<vmem>>, %arg5: memref<3x128xf32, #tpu.memory_space<vmem>>, %arg6: memref<384x128xbf16, #tpu.memory_space<vmem>>, %arg7: memref<1x128xf32, #tpu.memory_space<vmem>>, %arg8: memref<256x128xf32, #tpu.memory_space<vmem>>) attributes {dimension_semantics = [#tpu.dimension_semantics<parallel>], iteration_bounds = array<i64: 2>, scalar_prefetch = 0 : i64, scratch_operands = 0 : i64, tpu.core_type = #tpu.core_type<tc>, window_params = [{transform_indices = @transform_0, window_bounds = array<i64: 1, 256, 256>}, {transform_indices = @transform_1, window_bounds = array<i64: 256, 128>}, {transform_indices = @transform_2, window_bounds = array<i64: 256, 1>}, {pipeline_mode = #tpu.pipeline_mode<synchronous>, transform_indices = @transform_3, window_bounds = array<i64: 3, 128, 128>}, {pipeline_mode = #tpu.pipeline_mode<synchronous>, transform_indices = @transform_4, window_bounds = array<i64: 3, 128>}, {pipeline_mode = #tpu.pipeline_mode<synchronous>, transform_indices = @transform_5, window_bounds = array<i64: 384, 128>}, {pipeline_mode = #tpu.pipeline_mode<synchronous>, transform_indices = @transform_6, window_bounds = array<i64: 1, 128>}, {transform_indices = @transform_7, window_bounds = array<i64: 256, 128>}]} {
    %c0 = arith.constant 0 : index
    %c0_0 = arith.constant 0 : index
    %0 = vector.load %arg2[%c0, %c0_0] : memref<256x128xf32, #tpu.memory_space<vmem>>, vector<256x128xf32>
    %1 = arith.truncf %0 : vector<256x128xf32> to vector<256x128xbf16>
    %c0_1 = arith.constant 0 : index
    %c0_2 = arith.constant 0 : index
    %c0_3 = arith.constant 0 : index
    %2 = vector.load %arg1[%c0_1, %c0_2, %c0_3] : memref<1x256x256xbf16, #tpu.memory_space<vmem>>, vector<1x256x256xbf16>
    %3 = vector.shape_cast %2 : vector<1x256x256xbf16> to vector<256x256xbf16>
    %c0_4 = arith.constant 0 : index
    %c0_5 = arith.constant 0 : index
    %4 = vector.load %arg3[%c0_4, %c0_5] : memref<256x1xf32, #tpu.memory_space<vmem>>, vector<256x1xf32>
    %5 = arith.truncf %0 : vector<256x128xf32> to vector<256x128xbf16>
    %c0_6 = arith.constant 0 : index
    %c0_7 = arith.constant 0 : index
    %6 = vector.load %arg6[%c0_6, %c0_7] : memref<384x128xbf16, #tpu.memory_space<vmem>>, vector<128x128xbf16>
    %cst = arith.constant dense<0.000000e+00> : vector<256x128xf32>
    %7 = tpu.matmul %5, %6, %cst {dimension_numbers = #tpu.dot_dimension_numbers<[1], [0], [0], [1], [0, 0, 1, 1], [], []>} : vector<256x128xbf16>, vector<128x128xbf16>, vector<256x128xf32> -> vector<256x128xf32>
    %cst_8 = arith.constant dense<0.000000e+00> : vector<256x128xf32>
    %8 = tpu.matmul %3, %1, %cst_8 {dimension_numbers = #tpu.dot_dimension_numbers<[1], [0], [0], [1], [0, 0, 1, 1], [], []>} : vector<256x256xbf16>, vector<256x128xbf16>, vector<256x128xf32> -> vector<256x128xf32>
    %9 = arith.truncf %8 : vector<256x128xf32> to vector<256x128xbf16>
    %c0_9 = arith.constant 0 : index
    %c0_10 = arith.constant 0 : index
    %c0_11 = arith.constant 0 : index
    %10 = vector.load %arg4[%c0_9, %c0_10, %c0_11] : memref<3x128x128xbf16, #tpu.memory_space<vmem>>, vector<1x128x128xbf16>
    %11 = vector.shape_cast %10 : vector<1x128x128xbf16> to vector<128x128xbf16>
    %cst_12 = arith.constant dense<0.000000e+00> : vector<256x128xf32>
    %12 = tpu.matmul %9, %11, %cst_12 {dimension_numbers = #tpu.dot_dimension_numbers<[1], [0], [0], [1], [0, 0, 1, 1], [], []>} : vector<256x128xbf16>, vector<128x128xbf16>, vector<256x128xf32> -> vector<256x128xf32>
    %c0_13 = arith.constant 0 : index
    %c0_14 = arith.constant 0 : index
    %13 = vector.load %arg5[%c0_13, %c0_14] : memref<3x128xf32, #tpu.memory_space<vmem>>, vector<1x128xf32>
    %14 = vector.shape_cast %13 : vector<1x128xf32> to vector<128xf32>
    %15 = vector.shape_cast %14 : vector<128xf32> to vector<1x128xf32>
    %16 = vector.broadcast %15 : vector<1x128xf32> to vector<256x128xf32>
    %17 = arith.addf %12, %16 : vector<256x128xf32>
    %18 = arith.addf %17, %0 : vector<256x128xf32>
    %19 = arith.truncf %18 : vector<256x128xf32> to vector<256x128xbf16>
    %c128 = arith.constant 128 : index
    %c0_15 = arith.constant 0 : index
    %20 = vector.load %arg6[%c128, %c0_15] : memref<384x128xbf16, #tpu.memory_space<vmem>>, vector<128x128xbf16>
    %cst_16 = arith.constant dense<0.000000e+00> : vector<256x128xf32>
    %21 = tpu.matmul %19, %20, %cst_16 {dimension_numbers = #tpu.dot_dimension_numbers<[1], [0], [0], [1], [0, 0, 1, 1], [], []>} : vector<256x128xbf16>, vector<128x128xbf16>, vector<256x128xf32> -> vector<256x128xf32>
    %22 = arith.addf %7, %21 : vector<256x128xf32>
    %23 = vector.broadcast %4 : vector<256x1xf32> to vector<256x128xf32>
    %24 = arith.mulf %8, %23 : vector<256x128xf32>
    %25 = arith.truncf %24 : vector<256x128xf32> to vector<256x128xbf16>
    %c1 = arith.constant 1 : index
    %c0_17 = arith.constant 0 : index
    %c0_18 = arith.constant 0 : index
    %26 = vector.load %arg4[%c1, %c0_17, %c0_18] : memref<3x128x128xbf16, #tpu.memory_space<vmem>>, vector<1x128x128xbf16>
    %27 = vector.shape_cast %26 : vector<1x128x128xbf16> to vector<128x128xbf16>
    %cst_19 = arith.constant dense<0.000000e+00> : vector<256x128xf32>
    %28 = tpu.matmul %25, %27, %cst_19 {dimension_numbers = #tpu.dot_dimension_numbers<[1], [0], [0], [1], [0, 0, 1, 1], [], []>} : vector<256x128xbf16>, vector<128x128xbf16>, vector<256x128xf32> -> vector<256x128xf32>
    %c1_20 = arith.constant 1 : index
    %c0_21 = arith.constant 0 : index
    %29 = vector.load %arg5[%c1_20, %c0_21] : memref<3x128xf32, #tpu.memory_space<vmem>>, vector<1x128xf32>
    %30 = vector.shape_cast %29 : vector<1x128xf32> to vector<128xf32>
    %31 = vector.shape_cast %30 : vector<128xf32> to vector<1x128xf32>
    %32 = vector.broadcast %31 : vector<1x128xf32> to vector<256x128xf32>
    %33 = arith.addf %28, %32 : vector<256x128xf32>
    %cst_22 = arith.constant dense<0.000000e+00> : vector<256x128xf32>
    %34 = tpu.matmul %3, %19, %cst_22 {dimension_numbers = #tpu.dot_dimension_numbers<[1], [0], [0], [1], [0, 0, 1, 1], [], []>} : vector<256x256xbf16>, vector<256x128xbf16>, vector<256x128xf32> -> vector<256x128xf32>
    %35 = arith.truncf %34 : vector<256x128xf32> to vector<256x128xbf16>
    %c2 = arith.constant 2 : index
    %c0_23 = arith.constant 0 : index
    %c0_24 = arith.constant 0 : index
    %36 = vector.load %arg4[%c2, %c0_23, %c0_24] : memref<3x128x128xbf16, #tpu.memory_space<vmem>>, vector<1x128x128xbf16>
    %37 = vector.shape_cast %36 : vector<1x128x128xbf16> to vector<128x128xbf16>
    %cst_25 = arith.constant dense<0.000000e+00> : vector<256x128xf32>
    %38 = tpu.matmul %35, %37, %cst_25 {dimension_numbers = #tpu.dot_dimension_numbers<[1], [0], [0], [1], [0, 0, 1, 1], [], []>} : vector<256x128xbf16>, vector<128x128xbf16>, vector<256x128xf32> -> vector<256x128xf32>
    %c2_26 = arith.constant 2 : index
    %c0_27 = arith.constant 0 : index
    %39 = vector.load %arg5[%c2_26, %c0_27] : memref<3x128xf32, #tpu.memory_space<vmem>>, vector<1x128xf32>
    %40 = vector.shape_cast %39 : vector<1x128xf32> to vector<128xf32>
    %41 = vector.shape_cast %40 : vector<128xf32> to vector<1x128xf32>
    %42 = vector.broadcast %41 : vector<1x128xf32> to vector<256x128xf32>
    %43 = arith.addf %38, %42 : vector<256x128xf32>
    %44 = arith.addf %33, %43 : vector<256x128xf32>
    %45 = arith.truncf %44 : vector<256x128xf32> to vector<256x128xbf16>
    %c256 = arith.constant 256 : index
    %c0_28 = arith.constant 0 : index
    %46 = vector.load %arg6[%c256, %c0_28] : memref<384x128xbf16, #tpu.memory_space<vmem>>, vector<128x128xbf16>
    %cst_29 = arith.constant dense<0.000000e+00> : vector<256x128xf32>
    %47 = tpu.matmul %45, %46, %cst_29 {dimension_numbers = #tpu.dot_dimension_numbers<[1], [0], [0], [1], [0, 0, 1, 1], [], []>} : vector<256x128xbf16>, vector<128x128xbf16>, vector<256x128xf32> -> vector<256x128xf32>
    %48 = arith.addf %22, %47 : vector<256x128xf32>
    %c0_30 = arith.constant 0 : index
    %c0_31 = arith.constant 0 : index
    %49 = vector.load %arg7[%c0_30, %c0_31] : memref<1x128xf32, #tpu.memory_space<vmem>>, vector<1x128xf32>
    %50 = vector.broadcast %49 : vector<1x128xf32> to vector<256x128xf32>
    %51 = arith.addf %48, %50 : vector<256x128xf32>
    %cst_32 = arith.constant 0.000000e+00 : f32
    %52 = vector.broadcast %cst_32 : f32 to vector<256x128xf32>
    %53 = arith.cmpf oge, %51, %52 : vector<256x128xf32>
    %cst_33 = arith.constant 2.000000e-01 : f32
    %54 = vector.broadcast %cst_33 : f32 to vector<256x128xf32>
    %55 = arith.mulf %54, %51 : vector<256x128xf32>
    %56 = arith.select %53, %51, %55 : vector<256x128xi1>, vector<256x128xf32>
    %57 = arith.addf %56, %0 : vector<256x128xf32>
    %c0_34 = arith.constant 0 : index
    %c0_35 = arith.constant 0 : index
    %58 = vector.load %arg8[%c0_34, %c0_35] : memref<256x128xf32, #tpu.memory_space<vmem>>, vector<256x128xf32>
    tpu.vector_store %arg8[%c0_34, %c0_35], %57 {strides = array<i32>} : memref<256x128xf32, #tpu.memory_space<vmem>>, vector<256x128xf32>,
    return
  }
  func.func @transform_0(%arg0: i32) -> (i32, i32, i32) {
    %c0_i32 = arith.constant 0 : i32
    %c0_i32_0 = arith.constant 0 : i32
    %c0_i32_1 = arith.constant 0 : i32
    return %arg0, %c0_i32, %c0_i32_0 : i32, i32, i32
  }
  func.func @transform_1(%arg0: i32) -> (i32, i32) {
    %c0_i32 = arith.constant 0 : i32
    %c0_i32_0 = arith.constant 0 : i32
    return %arg0, %c0_i32 : i32, i32
  }
  func.func @transform_2(%arg0: i32) -> (i32, i32) {
    %c0_i32 = arith.constant 0 : i32
    %c0_i32_0 = arith.constant 0 : i32
    return %arg0, %c0_i32 : i32, i32
  }
  func.func @transform_3(%arg0: i32) -> (i32, i32, i32) {
    %c0_i32 = arith.constant 0 : i32
    %c0_i32_0 = arith.constant 0 : i32
    %c0_i32_1 = arith.constant 0 : i32
    %c0_i32_2 = arith.constant 0 : i32
    return %c0_i32, %c0_i32_0, %c0_i32_1 : i32, i32, i32
  }
  func.func @transform_4(%arg0: i32) -> (i32, i32) {
    %c0_i32 = arith.constant 0 : i32
    %c0_i32_0 = arith.constant 0 : i32
    %c0_i32_1 = arith.constant 0 : i32
    return %c0_i32, %c0_i32_0 : i32, i32
  }
  func.func @transform_5(%arg0: i32) -> (i32, i32) {
    %c0_i32 = arith.constant 0 : i32
    %c0_i32_0 = arith.constant 0 : i32
    %c0_i32_1 = arith.constant 0 : i32
    return %c0_i32, %c0_i32_0 : i32, i32
  }
  func.func @transform_6(%arg0: i32) -> (i32, i32) {
    %c0_i32 = arith.constant 0 : i32
    %c0_i32_0 = arith.constant 0 : i32
    %c0_i32_1 = arith.constant 0 : i32
    return %c0_i32, %c0_i32_0 : i32, i32
  }
  func.func @transform_7(%arg0: i32) -> (i32, i32) {
    %c0_i32 = arith.constant 0 : i32
    %c0_i32_0 = arith.constant 0 : i32
    return %arg0, %c0_i32 : i32, i32
  }
}

</mosaic_0001>

<bundles_post_ra>
// kernel: tpu_custom_call.1
= control target key start
LH: loop header
LB: loop body
LE: loop exit
PB: predicated region body
PF: predicated region fallthrough
CT: control target
= control target key end

     0   :  { %12 = vsyncpa [#allocation3], 0  ;;  %s5330_s0 = inlined_call_operand.vmem [shape: bf16[2,256,256], index: 0, kind: input, shape index: {}]   ;;  %s5331_s1 = inlined_call_operand.hbm [shape: f32[512,128], index: 1, kind: input, shape index: {}]   ;;  %s5332_s2 = inlined_call_operand.vmem [shape: f32[512,1], index: 2, kind: input, shape index: {}]   ;;  %s5333_s3 = inlined_call_operand.hbm [shape: bf16[3,128,128], index: 3, kind: input, shape index: {}]   ;;  %s5334_s4 = inlined_call_operand.vmem [shape: f32[3,128], index: 4, kind: input, shape index: {}]   ;;  %s5335_s5 = inlined_call_operand.hbm [shape: bf16[384,128], index: 5, kind: input, shape index: {}]   ;;  %s5336_s6 = inlined_call_operand.vmem [shape: f32[1,128], index: 6, kind: input, shape index: {}]   ;;  %s5337_s7 = inlined_call_operand.hbm [shape: f32[512,128], index: 7, kind: output, shape index: {}]  }
   0x1   :  { %14 = vsyncpa [#allocation3 + $0x1], 0 }
   0x2   :  { %15 = vsyncpa [#allocation6], 0 }
   0x3   :  { %16 = vsyncpa [#allocation4], 0 }
   0x4   :  { %18 = vsyncpa [#allocation4 + $0x1], 0  ;;  %s4436_s24 = smov 0   ;;  %s4438_s25 = smov 0  }
   0x5   :  { %s4440_s26 = smov 0   ;;  %s4442_s27 = smov 0  }
   0x6 LB: > { %s4457_s28 = sadd.s32 4294967295, %s4383_s27   ;;  %s3029_s29 = sadd.s32 4294967294, %s4383_s27   ;;  %s4383_s27 = sphi %s4442_s27, %s5401_s27   ;;  %s4379_s26 = sphi %s4440_s26, %s5400_s26   ;;  %s4375_s25 = sphi %s4438_s25, %s5399_s25   ;;  %s4371_s24 = sphi %s4436_s24, %s5398_s24  }
   0x7   : > { %p70_p0 = scmp.ne.s32.totalorder %s4375_s25, %s4371_s24  ;;  %p5338_p1 = scmp.eq.s32.totalorder %s4457_s28, 0 }
   0x8   : > { %p210_p3 = scmp.eq.s32.totalorder %s3029_s29, 1  ;;  %p3030_p5 = scmp.ge.s32.totalorder %s4383_s27, 1 }
   0x9   : > { %p4466_p4 = por %p5338_p1, %p70_p0  ;;  %p217_p7 = scmp.lt.s32.totalorder %s4383_s27, 3 }
   0xa   : > { %p4471_p6 = por %p210_p3, %p70_p0  ;;  %s4385_s10 = smov [#allocation5]  }
   0xb   : > { %s5352_s30 = scalar_select %p4466_p4, 1, 0 }
   0xc   : > { %s5353_s8 = scalar_select %p4471_p6, 1, 0 }
   0xd   : > { %p4476_p8 = pnand %p3030_p5, %p217_p7  ;;  %s229_s11 = sshll.u32 %s4385_s10, 4  ;;  %s4480_s11 = int_to_ptr.vmem [resolvable:$true] %s229_s11 }
   0xe   : > { %s4386_s13 = smov [#allocation7]   ;;  %s4227_s17 = scalar_lea.hbm %s5333_s3, 3072 }
   0xf   : > { %p3982_p9 = pneg %p4476_p8  ;;  %s245_s14 = sshll.u32 %s4386_s13, 4  ;;  %s4491_s14 = int_to_ptr.vmem [resolvable:$true] %s245_s14 }
  0x10   : > { %p4228_p12 = scmp.ne.s32.totalorder %s5333_s3, %s4227_s17  ;;  %p4234_p5 = scmp.lt.u32.totalorder %s4227_s17, %s5333_s3 }
  0x11   : > { %p4487_p11 = pnand %p3982_p9, %p5338_p1 }
  0x13   : > { %p4229_p13 = pneg %p4487_p11 }
  0x15   : > { %p4230_p0 = pnand %p4229_p13, %p4228_p12 }
  0x17   : > { %p4231_p3 = pneg %p4230_p0 }
  0x19   : > { %p4236_p7 = pnand %p4234_p5, %p4231_p3 }
  0x1b   : > { %4239 = shalt.err (!%p4236_p7)
}
  0x1c   : > { %s4240_s22 = scalar_lea.vmem %s4480_s11, 3072  ;;  %p4248_p2 = scmp.lt.s32.totalorder %s4480_s11, %s4480_s11 }
  0x1d   : > { %p4241_p9 = scmp.ne.s32.totalorder %s4480_s11, %s4240_s22  ;;  %p4249_p12 = scmp.lt.s32.totalorder %s4240_s22, %s4240_s22 }
  0x1f   : > { %p4243_p10 = pnand %p4241_p9, %p4229_p13  ;;  %p4250_p0 = por %p4249_p12, %p4248_p2 }
  0x21   : > { %p4244_p1 = pneg %p4243_p10 }
  0x23   : > { %p4251_p6 = pnand %p4250_p0, %p4244_p1 }
  0x25   : > { %4254 = shalt.err (!%p4251_p6)
}
  0x26   : > { %s4387_s23 = smov 64   ;;  %s4388_s29 = smov 4  }
  0x27   : > { %3985 = dma.hbm_to_vmem [thread:$0]  (!%p4487_p11), %s5333_s3, 3072, %s4480_s11, [#allocation6], %s4387_s23, %s4387_s23, %s4388_s29  }
  0x28   : > { %s4255_s17 = scalar_lea.hbm %s5335_s5, 3072 }
  0x29   : > { %p4256_p2 = scmp.ne.s32.totalorder %s5335_s5, %s4255_s17  ;;  %p4262_p10 = scmp.lt.u32.totalorder %s4255_s17, %s5335_s5 }
  0x2b   : > { %p4258_p1 = pnand %p4256_p2, %p4229_p13 }
  0x2d   : > { %p4259_p6 = pneg %p4258_p1 }
  0x2f   : > { %p4264_p3 = pnand %p4262_p10, %p4259_p6 }
  0x31   : > { %4267 = shalt.err (!%p4264_p3)
}
  0x32   : > { %s4268_s11 = scalar_lea.vmem %s4491_s14, 3072  ;;  %p4276_p12 = scmp.lt.s32.totalorder %s4491_s14, %s4491_s14 }
  0x33   : > { %p4269_p5 = scmp.ne.s32.totalorder %s4491_s14, %s4268_s11  ;;  %p4277_p0 = scmp.lt.s32.totalorder %s4268_s11, %s4268_s11 }
  0x35   : > { %p4271_p7 = pnand %p4269_p5, %p4229_p13  ;;  %p4278_p2 = por %p4277_p0, %p4276_p12 }
  0x37   : > { %p4272_p9 = pneg %p4271_p7 }
  0x39   : > { %p4279_p1 = pnand %p4278_p2, %p4272_p9 }
  0x3b   : > { %4282 = shalt.err (!%p4279_p1)
}
  0x3c   : > { %3988 = dma.hbm_to_vmem [thread:$0]  (!%p4487_p11), %s5335_s5, 3072, %s4491_s14, [#allocation6], %s4387_s23, %s4387_s23, %s4388_s29  }
  0x3d   : > { %s4546_s13 = sadd.s32 1, %s4383_s27   ;;  %s57_s12 = sadd.s32 1, %s4379_s26 }
  0x3e   : > { %s54_s15 = ssub.s32 %s4383_s27, %s4546_s13  ;;  %p64_p13 = scmp.ne.s32.totalorder %s4379_s26, %s4375_s25 }
  0x3f   : > { %p55_p6 = scmp.eq.s32.totalorder %s54_s15, 0  ;;  %p65_p10 = scmp.eq.s32.totalorder %s4383_s27, 0 }
  0x40   : > { %p5356_p3 = scmp.eq.s32.totalorder %s4457_s28, 1  ;;  %p3999_p7 = scmp.lt.s32.totalorder %s4383_s27, 2 }
  0x41   : > { %s4562_s17 = scalar_select %p55_p6, %s4379_s26, %s57_s12  }
  0x42   : > { %p4556_p5 = por %p5356_p3, %p64_p13  ;;  %p66_p9 = por %p65_p10, %p64_p13 }
  0x43   : > { %s270_s18 = sand.u32 1, %s4379_s26   ;;  %s3135_s14 = sshll.u32 %s4383_s27, 12 }
  0x44   : > { %s5357_s16 = scalar_select %p4556_p5, 1, 0 }
  0x45   : > { %s3034_s19 = sshll.u32 %s270_s18, 8  ;;  %s4569_s20 = scalar_lea.hbm %s5331_s1, %s3135_s14 }
  0x46   : > { %s274_s21 = scalar_lea.vmem [#allocation2], %s3034_s19  ;;  %p4573_p11 = pnand %p3999_p7, %p66_p9 }
  0x47   : > { %s281_s11 = sshll.u32 %s274_s21, 4  ;;  %s4577_s10 = scalar_lea.sflag [#allocation3], %s270_s18  ;;  %s4571_s11 = int_to_ptr.vmem [resolvable:$true] %s281_s11 }
  0x48   : > { %s4283_s12 = scalar_lea.hbm %s4569_s20, 4096  ;;  %p4285_p0 = pneg %p4573_p11 }
  0x49   : > { %p4284_p12 = scmp.ne.s32.totalorder %s4569_s20, %s4283_s12  ;;  %s4288_s14 = scalar_lea.hbm %s5331_s1, 8192 }
  0x4a   : > { %p4289_p13 = scmp.lt.u32.totalorder %s4569_s20, %s5331_s1  ;;  %p4290_p6 = scmp.lt.u32.totalorder %s4288_s14, %s4283_s12 }
  0x4b   : > { %p4286_p2 = pnand %p4285_p0, %p4284_p12  ;;  %p4292_p3 = scmp.lt.u32.totalorder %s4283_s12, %s4569_s20 }
  0x4c   : > { %p4291_p10 = por %p4290_p6, %p4289_p13 }
  0x4d   : > { %p4287_p1 = pneg %p4286_p2 }
  0x4e   : > { %p4293_p7 = por %p4292_p3, %p4291_p10 }
  0x50   : > { %p4294_p9 = pnand %p4293_p7, %p4287_p1 }
  0x52   : > { %4297 = shalt.err (!%p4294_p9)
}
  0x53   : > { %s4298_s18 = scalar_lea.vmem %s4571_s11, 4096  ;;  %s4389_s21 = smov [#allocation2]  }
  0x54   : > { %p4299_p12 = scmp.ne.s32.totalorder %s4571_s11, %s4298_s18  ;;  %s4303_s15 = sshll.u32 %s4389_s21, 4  ;;  %s4304_s15 = int_to_ptr.vmem [resolvable:$false] %s4303_s15 }
  0x55   : > { %s4305_s19 = scalar_lea.vmem %s4304_s15, 8192  ;;  %p4306_p4 = scmp.lt.s32.totalorder %s4571_s11, %s4304_s15 }
  0x56   : > { %p4301_p2 = pnand %p4299_p12, %p4285_p0  ;;  %p4307_p13 = scmp.lt.s32.totalorder %s4305_s19, %s4298_s18 }
  0x58   : > { %p4302_p5 = pneg %p4301_p2  ;;  %p4308_p6 = por %p4307_p13, %p4306_p4 }
  0x5a   : > { %p4309_p10 = pnand %p4308_p6, %p4302_p5 }
  0x5c   : > { %4312 = shalt.err (!%p4309_p10)
}
  0x5d   : > { %s4390_s12 = smov 128   ;;  %s4391_s14 = smov 8  }
  0x5e   : > { %3992 = dma.hbm_to_vmem [thread:$0]  (!%p4573_p11), %s4569_s20, 4096, %s4571_s11, %s4577_s10, %s4390_s12, %s4390_s12, %s4391_s14  }
  0x5f   : > { %302 = sbr.rel (%p4476_p8) target bundleno = 1476 (0x5c4), region = 48 }
  0x66   : > { %s4608_s23 = sand.u32 1, %s4375_s25   ;;  %p5359_p4 = scmp.ne.s32.totalorder %s5352_s30, 0 }
  0x67   : > { %s3038_s29 = sshll.u32 %s4608_s23, 8  ;;  %s305_s18 = scalar_lea.sflag [#allocation3], %s4608_s23 }
  0x68   : > { %s4614_s21 = scalar_lea.vmem [#allocation2], %s3038_s29 }
  0x69   : > { %4358 = dma.done.wait (%p5359_p4), %s305_s18, 4096  }
  0x6a   : > { %4360 = vsyncadd (%p5359_p4), %s305_s18, 4294963200  ;;  %p5360_p5 = scmp.eq.s32.totalorder %s4457_s28, 0 }
  0x6c   : > { %4362 = dma.done.wait (%p5360_p5), [#allocation6], 6144   ;;  %p5361_p8 = pmov %p5360_p5 }
  0x6d   : > { %v4392_v0 = vmov 0   ;;  %p357_p11 = scmp.lt.s32.totalorder %s4457_s28, 1  ;;  %v387_v1 = vld [vmem:[%s4614_s21 + $0x80] sm:$0xff]  ;;  %v388_v2 = vld [vmem:[%s4614_s21 + $0x88] sm:$0xff]  ;;  %v389_v6 = vld [vmem:[%s4614_s21 + $0x90] sm:$0xff]  ;;  %s3044_s10 = sshll.u32 %s4457_s28, 5 }
  0x6e   : > { %4364 = vsyncadd (%p5361_p8), [#allocation6], 4294961152  ;;  %4044 = vset.pattern.permute.xlu0 %v4392_v0  ;;  %4045 = vset.pattern.permute.xlu1 %v4392_v0  ;;  %v371_v3 = vld [vmem:[%s4614_s21] sm:$0xff]  ;;  %v4628_v4 = vpack.c.bf16 %v388_v2, %v387_v1  ;;  %v372_v5 = vld [vmem:[%s4614_s21 + $0x8] sm:$0xff]  ;;  %p364_p0 = scmp.lt.s32.totalorder %s3044_s10, 63  ;;  %s5187_s19 = scalar_lea.vmem [#allocation8], %s3038_s29 }
  0x6f   : > { %v390_v7 = vld [vmem:[%s4614_s21 + $0x98] sm:$0xff]  ;;  %s358_s30 = scalar_select %p357_p11, %s4457_s28, 1  ;;  %v4634_v8 = vpack.c.bf16 %v372_v5, %v371_v3  ;;  %v373_v10 = vld [vmem:[%s4614_s21 + $0x10] sm:$0xff]  ;;  %v391_v12 = vld [vmem:[%s4614_s21 + $0xa0] sm:$0xff] }
  0x70   : > { %5362 = vst [vmem:[#allocation12_spill] sm:$0xff] %v4628_v4  ;;  %v4636_v9 = vpack.c.bf16 %v390_v7, %v389_v6  ;;  %v374_v11 = vld [vmem:[%s4614_s21 + $0x18] sm:$0xff]  ;;  %3138 = vmatprep.subr.bf16.mxu0 %v4628_v4  ;;  %v392_v13 = vld [vmem:[%s4614_s21 + $0xa8] sm:$0xff]  ;;  %3794 = vmatprep.subr.bf16.mxu1 %v4628_v4  ;;  %v375_v16 = vld [vmem:[%s4614_s21 + $0x20] sm:$0xff]  ;;  %s5403_s10 = smov (!%p364_p0, %s3044_s10), 63  ;;  %s3137_s29 = sshll.u32 %s4457_s28, 12 }
  0x71   : > { %3139 = vmatpush3.bf16.msra.mxu0 %v4634_v8  ;;  %v4645_v14 = vpack.c.bf16 %v374_v11, %v373_v10  ;;  %3802 = vmatpush3.bf16.msra.mxu1 %v4634_v8  ;;  %v4649_v15 = vpack.c.bf16 %v392_v13, %v391_v12  ;;  %v376_v17 = vld [vmem:[%s4614_s21 + $0x28] sm:$0xff]  ;;  %s3136_s9 = sshll.u32 %s358_s30, 8  ;;  %v393_v18 = vld [vmem:[%s4614_s21 + $0xb0] sm:$0xff]  ;;  %v394_v19 = vld [vmem:[%s4614_s21 + $0xb8] sm:$0xff]  ;;  %s3045_s15 = sshll.u32 %s5403_s10, 3 }
  0x72   : > { %5363 = vst [vmem:[#allocation13_spill] sm:$0xff] %v4636_v9  ;;  %3140 = vmatprep.subr.bf16.mxu0 %v4636_v9  ;;  %3795 = vmatprep.subr.bf16.mxu1 %v4636_v9  ;;  %v4657_v20 = vpack.c.bf16 %v376_v17, %v375_v16  ;;  %s4662_s22 = scalar_lea.vmem %s5330_s0, %s3136_s9  ;;  %v4666_v21 = vpack.c.bf16 %v394_v19, %v393_v18  ;;  %v377_v22 = vld [vmem:[%s4614_s21 + $0x30] sm:$0xff]  ;;  %v378_v23 = vld [vmem:[%s4614_s21 + $0x38] sm:$0xff]  ;;  %v395_v24 = vld [vmem:[%s4614_s21 + $0xc0] sm:$0xff]  ;;  %s4725_s14 = scalar_lea.vmem %s5332_s2, %s3045_s15 }
  0x73   : > { %5364 = vst [vmem:[#allocation14_spill] sm:$0xff] %v4649_v15  ;;  %v396_v25 = vld [vmem:[%s4614_s21 + $0xc8] sm:$0xff]  ;;  %v4675_v27 = vpack.c.bf16 %v378_v23, %v377_v22  ;;  %v379_v28 = vld [vmem:[%s4614_s21 + $0x40] sm:$0xff]  ;;  %v397_v31 = vld [vmem:[%s4614_s21 + $0xd0] sm:$0xff]  ;;  %s2913_s12 = sshll.u32 %s5187_s19, 4  ;;  %s5280_s18 = scalar_lea.hbm %s5337_s7, %s3137_s29  ;;  %s5282_s12 = int_to_ptr.vmem [resolvable:$true] %s2913_s12 }
  0x74   : > { %5365 = vst [vmem:[#allocation15_spill] sm:$0xff] %v4666_v21  ;;  %v4048_v26 = vld [vmem:[%s4662_s22 + $0x4] ss:$8 sps:$4 sm:$0xff]   ;;  %v4680_v29 = vpack.c.bf16 %v396_v25, %v395_v24  ;;  %v398_v32 = vld [vmem:[%s4614_s21 + $0xd8] sm:$0xff]  ;;  %v381_v33 = vld [vmem:[%s4614_s21 + $0x50] sm:$0xff]  ;;  %s2900_s30 = scalar_lea.sflag [#allocation4], %s4608_s23 }
  0x75   : > { %3141 = vmatpush3.bf16.msra.mxu0 %v4645_v14  ;;  %3803 = vmatpush3.bf16.msra.mxu1 %v4645_v14  ;;  %v380_v30 = vld [vmem:[%s4614_s21 + $0x48] sm:$0xff]  ;;  %v382_v35 = vld [vmem:[%s4614_s21 + $0x58] sm:$0xff]  ;;  %v4694_v36 = vpack.c.bf16 %v398_v32, %v397_v31  ;;  %v399_v37 = vld [vmem:[%s4614_s21 + $0xe0] sm:$0xff]  ;;  %s4313_s9 = scalar_lea.vmem %s5282_s12, 4096  ;;  %p5395_p3 = scmp.ne.s32.totalorder %s5357_s16, 0 }
  0x76   : > { %3142 = vmatprep.subr.bf16.mxu0 %v4649_v15  ;;  %3796 = vmatprep.subr.bf16.mxu1 %v4649_v15  ;;  %5366 = vst [vmem:[#allocation16_spill] sm:$0xff] %v4680_v29  ;;  %v4689_v34 = vpack.c.bf16 %v380_v30, %v379_v28  ;;  %v400_v38 = vld [vmem:[%s4614_s21 + $0xe8] sm:$0xff]  ;;  %v4701_v40 = vpack.c.bf16 %v382_v35, %v381_v33  ;;  %v383_v41 = vld [vmem:[%s4614_s21 + $0x60] sm:$0xff]  ;;  %v401_v44 = vld [vmem:[%s4614_s21 + $0xf0] sm:$0xff]  ;;  %p4314_p1 = scmp.ne.s32.totalorder %s5282_s12, %s4313_s9  ;;  %s4393_s20 = smov [#allocation8]  }
  0x77   : > { %691 = vmatprep.mubr.bf16.mxu0 %v4048_v26  ;;  %5367 = vst [vmem:[#allocation17_spill] sm:$0xff] %v4694_v36  ;;  %v4062_v39 = vld [vmem:[%s4662_s22 + $0x84] ss:$8 sps:$4 sm:$0xff]   ;;  %v4707_v43 = vpack.c.bf16 %v400_v38, %v399_v37  ;;  %v402_v45 = vld [vmem:[%s4614_s21 + $0xf8] sm:$0xff]  ;;  %v385_v47 = vld [vmem:[%s4614_s21 + $0x70] sm:$0xff]  ;;  %s4317_s11 = sshll.u32 %s4393_s20, 4  ;;  %s4318_s11 = int_to_ptr.vmem [resolvable:$false] %s4317_s11 }
  0x78   : > { %5368 = vst [vmem:[#allocation18_spill] sm:$0xff] %v4701_v40  ;;  %v384_v42 = vld [vmem:[%s4614_s21 + $0x68] sm:$0xff]  ;;  %755 = vmatprep.mubr.bf16.mxu1 %v4062_v39  ;;  %v4718_v48 = vpack.c.bf16 %v402_v45, %v401_v44  ;;  %v386_v49 = vld [vmem:[%s4614_s21 + $0x78] sm:$0xff]  ;;  %v451_v52 = vld [vmem:[%s4725_s14] sm:$0xff]  ;;  %p4315_p7 = pnand %p4314_p1, %p5395_p3  ;;  %p4320_p12 = scmp.lt.s32.totalorder %s5282_s12, %s4318_s11 }
  0x79   : > { %3143 = vmatpush3.bf16.msra.mxu0 %v4657_v20  ;;  %3804 = vmatpush3.bf16.msra.mxu1 %v4657_v20  ;;  %5369 = vst [vmem:[#allocation19_spill] sm:$0xff] %v4707_v43  ;;  %v4713_v46 = vpack.c.bf16 %v384_v42, %v383_v41  ;;  %v4728_v50 = vpack.c.bf16 %v386_v49, %v385_v47  ;;  %v4046_v51 = vld [vmem:[%s4662_s22] ss:$8 sps:$4 sm:$0xff]   ;;  %v4049_v54 = vld [vmem:[%s4662_s22 + $0x14] ss:$8 sps:$4 sm:$0xff]  }
  0x7a   : > { %3144 = vmatprep.subr.bf16.mxu0 %v4666_v21  ;;  %3797 = vmatprep.subr.bf16.mxu1 %v4666_v21  ;;  %5371 = vst [vmem:[#allocation21_spill] sm:$0xff] %v4718_v48  ;;  %v4060_v53 = vld [vmem:[%s4662_s22 + $0x80] ss:$8 sps:$4 sm:$0xff]   ;;  %v4066_v55 = vld [vmem:[%s4662_s22 + $0x94] ss:$8 sps:$4 sm:$0xff]   ;;  %p4316_p9 = pneg %p4315_p7 }
  0x7b   : > { %5370 = vst [vmem:[#allocation20_spill] sm:$0xff] %v4713_v46  ;;  %5372 = vst [vmem:[#allocation22_spill] sm:$0xff] %v4728_v50  ;;  %1550 = vperm.xlu0 %4044, %v451_v52   ;;  %v453_v56 = vld [vmem:[%s4725_s14 + $0x10] sm:$0xff]  ;;  %v452_v57 = vld [vmem:[%s4725_s14 + $0x8] sm:$0xff] }
  0x7c   : > { %1560 = vperm.xlu1 %4045, %v453_v56   ;;  %v454_v58 = vld [vmem:[%s4725_s14 + $0x18] sm:$0xff]  ;;  %v455_v59 = vld [vmem:[%s4725_s14 + $0x20] sm:$0xff]  ;;  %v456_v60 = vld [vmem:[%s4725_s14 + $0x28] sm:$0xff] }
  0x7d   : > { %3145 = vmatpush3.bf16.msra.mxu0 %v4675_v27  ;;  %3805 = vmatpush3.bf16.msra.mxu1 %v4675_v27  ;;  %v4051_v61 = vld [vmem:[%s4662_s22 + $0x10] ss:$8 sps:$4 sm:$0xff]   ;;  %v4052_v63 = vld [vmem:[%s4662_s22 + $0x24] ss:$8 sps:$4 sm:$0xff]   ;;  %v4054_v10 = vld [vmem:[%s4662_s22 + $0x20] ss:$8 sps:$4 sm:$0xff]  }
  0x7e   : > { %3146 = vmatprep.subr.bf16.mxu0 %v4680_v29  ;;  %3798 = vmatprep.subr.bf16.mxu1 %v4680_v29  ;;  %v4069_v62 = vld [vmem:[%s4662_s22 + $0x90] ss:$8 sps:$4 sm:$0xff]   ;;  %v4072_v0 = vld [vmem:[%s4662_s22 + $0xa4] ss:$8 sps:$4 sm:$0xff]   ;;  %v4075_v11 = vld [vmem:[%s4662_s22 + $0xa0] ss:$8 sps:$4 sm:$0xff]  }
  0x7f   : > { %1555 = vperm.xlu0 %4044, %v452_v57   ;;  %v457_v1 = vld [vmem:[%s4725_s14 + $0x30] sm:$0xff]  ;;  %v458_v2 = vld [vmem:[%s4725_s14 + $0x38] sm:$0xff]  ;;  %v4094_v3 = vld [vmem:[#allocation5] sm:$0xff]  }
  0x80   : > { %1565 = vperm.xlu1 %4045, %v454_v58   ;;  %v4095_v5 = vld [vmem:[#allocation5 + $0x40] sm:$0xff]   ;;  %v460_v7 = vld [vmem:[%s4725_s14 + $0x48] sm:$0xff]  ;;  %v4055_v13 = vld [vmem:[%s4662_s22 + $0x34] ss:$8 sps:$4 sm:$0xff]  }
  0x81   : > { %3147 = vmatpush3.bf16.msra.mxu0 %v4689_v34  ;;  %3806 = vmatpush3.bf16.msra.mxu1 %v4689_v34  ;;  %v459_v6 = vld [vmem:[%s4725_s14 + $0x40] sm:$0xff]  ;;  %v4096_v12 = vld [vmem:[#allocation5 + $0x8] sm:$0xff]   ;;  %v4078_v17 = vld [vmem:[%s4662_s22 + $0xb4] ss:$8 sps:$4 sm:$0xff]  }
  0x82   : > { %3148 = vmatprep.subr.bf16.mxu0 %v4694_v36  ;;  %3799 = vmatprep.subr.bf16.mxu1 %v4694_v36  ;;  %v4097_v16 = vld [vmem:[#allocation5 + $0x48] sm:$0xff]   ;;  %v461_v18 = vld [vmem:[%s4725_s14 + $0x50] sm:$0xff]  ;;  %v462_v19 = vld [vmem:[%s4725_s14 + $0x58] sm:$0xff] }
  0x83   : > { %1570 = vperm.xlu0 %4044, %v455_v59   ;;  %v4098_v22 = vld [vmem:[#allocation5 + $0x10] sm:$0xff]   ;;  %v464_v24 = vld [vmem:[%s4725_s14 + $0x68] sm:$0xff]  ;;  %v463_v25 = vld [vmem:[%s4725_s14 + $0x60] sm:$0xff] }
  0x84   : > { %1575 = vperm.xlu1 %4045, %v456_v60   ;;  %v4099_v23 = vld [vmem:[#allocation5 + $0x50] sm:$0xff]   ;;  %v4058_v30 = vld [vmem:[%s4662_s22 + $0x44] ss:$8 sps:$4 sm:$0xff]   ;;  %v466_v32 = vld [vmem:[%s4725_s14 + $0x78] sm:$0xff] }
  0x85   : > { %3149 = vmatpush3.bf16.msra.mxu0 %v4701_v40  ;;  %3807 = vmatpush3.bf16.msra.mxu1 %v4701_v40  ;;  %v4057_v26 = vld [vmem:[%s4662_s22 + $0x30] ss:$8 sps:$4 sm:$0xff]   ;;  %v4082_v31 = vld [vmem:[%s4662_s22 + $0xc4] ss:$8 sps:$4 sm:$0xff]   ;;  %v4063_v41 = vld [vmem:[%s4662_s22 + $0x40] ss:$8 sps:$4 sm:$0xff]  }
  0x86   : > { %3150 = vmatprep.subr.bf16.mxu0 %v4707_v43  ;;  %3800 = vmatprep.subr.bf16.mxu1 %v4707_v43  ;;  %v4081_v28 = vld [vmem:[%s4662_s22 + $0xb0] ss:$8 sps:$4 sm:$0xff]   ;;  %v468_v38 = vld [vmem:[%s4725_s14 + $0x88] sm:$0xff]  ;;  %v467_v39 = vld [vmem:[%s4725_s14 + $0x80] sm:$0xff] }
  0x87   : > { %1580 = vperm.xlu0 %4044, %v457_v1   ;;  %v465_v33 = vld [vmem:[%s4725_s14 + $0x70] sm:$0xff]  ;;  %v4100_v35 = vld [vmem:[#allocation5 + $0x18] sm:$0xff]   ;;  %v4084_v42 = vld [vmem:[%s4662_s22 + $0xc0] ss:$8 sps:$4 sm:$0xff]  }
  0x88   : > { %1585 = vperm.xlu1 %4045, %v458_v2   ;;  %v4101_v37 = vld [vmem:[#allocation5 + $0x58] sm:$0xff]   ;;  %v469_v49 = vld [vmem:[%s4725_s14 + $0x90] sm:$0xff]  ;;  %v471_v52 = vld [vmem:[%s4725_s14 + $0xa0] sm:$0xff] }
  0x89   : > { %3151 = vmatpush3.bf16.msra.mxu0 %v4713_v46  ;;  %3808 = vmatpush3.bf16.msra.mxu1 %v4713_v46  ;;  %v4064_v44 = vld [vmem:[%s4662_s22 + $0x54] ss:$8 sps:$4 sm:$0xff]   ;;  %v4088_v56 = vld [vmem:[%s4662_s22 + $0xe4] ss:$8 sps:$4 sm:$0xff]  }
  0x8a   : > { %3152 = vmatprep.subr.bf16.mxu0 %v4718_v48  ;;  %3801 = vmatprep.subr.bf16.mxu1 %v4718_v48  ;;  %v4085_v45 = vld [vmem:[%s4662_s22 + $0xd4] ss:$8 sps:$4 sm:$0xff]   ;;  %v476_v59 = vld [vmem:[%s4725_s14 + $0xc8] sm:$0xff]  ;;  %v475_v60 = vld [vmem:[%s4725_s14 + $0xc0] sm:$0xff] }
  0x8b   : > { %1590 = vperm.xlu0 %4044, %v459_v6   ;;  %v470_v47 = vld [vmem:[%s4725_s14 + $0x98] sm:$0xff]  ;;  %v473_v58 = vld [vmem:[%s4725_s14 + $0xb0] sm:$0xff] }
  0x8c   : > { %1595 = vperm.xlu1 %4045, %v460_v7   ;;  %v474_v57 = vld [vmem:[%s4725_s14 + $0xb8] sm:$0xff]  ;;  %v477_v2 = vld [vmem:[%s4725_s14 + $0xd0] sm:$0xff] }
  0x8d   : > { %3153 = vmatpush3.bf16.msra.mxu0 %v4728_v50  ;;  %3809 = vmatpush3.bf16.msra.mxu1 %v4728_v50  ;;  %v478_v1 = vld [vmem:[%s4725_s14 + $0xd8] sm:$0xff] }
  0x8e   : > { %3506 = vmatprep.subr.bf16.mxu1 %v4094_v3  ;;  %3650 = vmatprep.subr.bf16.mxu0 %v4095_v5  ;;  %v4809_v6 = vld [vmem:[%s4662_s22 + $0x70] ss:$8 sps:$4 sm:$0xff]  }
  0x8f   : > { %1600 = vperm.xlu0 %4044, %v461_v18   ;;  %v4812_v7 = vld [vmem:[%s4662_s22 + $0xf0] ss:$8 sps:$4 sm:$0xff]  }
  0x90   : > { %692 = vmatmul.mubr.bf16.vlgmr.msra.gmra.mrb[0].mxu0 %v4046_v51  ;;  %756 = vmatmul.mubr.bf16.vlgmr.msra.gmra.mrb[0].mxu1 %v4060_v53  ;;  %v472_v51 = vld [vmem:[%s4725_s14 + $0xa8] sm:$0xff]  ;;  %v4068_v53 = vld [vmem:[%s4662_s22 + $0x50] ss:$8 sps:$4 sm:$0xff]  }
  0x91   : > { %699 = vmatprep.mubr.bf16.mxu0 %v4049_v54  ;;  %763 = vmatprep.mubr.bf16.mxu1 %v4066_v55  ;;  %v4087_v54 = vld [vmem:[%s4662_s22 + $0xd0] ss:$8 sps:$4 sm:$0xff]   ;;  %v4780_v55 = vld [vmem:[%s4662_s22 + $0x64] ss:$8 sps:$4 sm:$0xff]  }
  0x92   : > { %3507 = vmatpush3.bf16.msra.mxu1 %v4094_v3  ;;  %3651 = vmatpush3.bf16.msra.mxu0 %v4095_v5  ;;  %v480_v3 = vld [vmem:[%s4725_s14 + $0xe8] sm:$0xff]  ;;  %v479_v5 = vld [vmem:[%s4725_s14 + $0xe0] sm:$0xff]  ;;  %v4106_v18 = vld [vmem:[#allocation5 + $0x30] sm:$0xff]  }
  0x93   : > { %3508 = vmatprep.subr.bf16.mxu1 %v4096_v12  ;;  %3652 = vmatprep.subr.bf16.mxu0 %v4097_v16 }
  0x94   : > { %1605 = vperm.xlu1 %4045, %v462_v19   ;;  %1610 = vperm.xlu0 %4044, %v463_v25   ;;  %v4107_v19 = vld [vmem:[#allocation5 + $0x70] sm:$0xff]  }
  0x96   : > { %3509 = vmatpush3.bf16.msra.mxu1 %v4096_v12  ;;  %3653 = vmatpush3.bf16.msra.mxu0 %v4097_v16  ;;  %v4102_v12 = vld [vmem:[#allocation5 + $0x20] sm:$0xff]   ;;  %v4104_v16 = vld [vmem:[#allocation5 + $0x28] sm:$0xff]  }
  0x97   : > { %3510 = vmatprep.subr.bf16.mxu1 %v4098_v22  ;;  %3654 = vmatprep.subr.bf16.mxu0 %v4099_v23 }
  0x98   : > { %700 = vmatmul.mubr.bf16.gmra.mrb[4].mxu0 %v4051_v61  ;;  %764 = vmatmul.mubr.bf16.gmra.mrb[4].mxu1 %v4069_v62  ;;  %v4789_v61 = vld [vmem:[%s4662_s22 + $0x60] ss:$8 sps:$4 sm:$0xff]  }
  0x99   : > { %707 = vmatprep.mubr.bf16.mxu0 %v4052_v63  ;;  %771 = vmatprep.mubr.bf16.mxu1 %v4072_v0  ;;  %v4792_v62 = vld [vmem:[%s4662_s22 + $0xe0] ss:$8 sps:$4 sm:$0xff]   ;;  %v4795_v63 = vld [vmem:[%s4662_s22 + $0x74] ss:$8 sps:$4 sm:$0xff]  }
  0x9a   : > { %1615 = vperm.xlu1 %4045, %v464_v24   ;;  %3511 = vmatpush3.bf16.msra.mxu1 %v4098_v22  ;;  %v4798_v0 = vld [vmem:[%s4662_s22 + $0xf4] ss:$8 sps:$4 sm:$0xff]  }
  0x9b   : > { %3655 = vmatpush3.bf16.msra.mxu0 %v4099_v23  ;;  %1620 = vperm.xlu0 %4044, %v465_v33   ;;  %v4108_v22 = vld [vmem:[#allocation5 + $0x38] sm:$0xff]  }
  0x9c   : > { %3512 = vmatprep.subr.bf16.mxu1 %v4100_v35  ;;  %3656 = vmatprep.subr.bf16.mxu0 %v4101_v37  ;;  %v4109_v23 = vld [vmem:[#allocation5 + $0x78] sm:$0xff]  }
  0x9e   : > { %1625 = vperm.xlu1 %4045, %v466_v32   ;;  %3513 = vmatpush3.bf16.msra.mxu1 %v4100_v35  ;;  %v4826_v35 = vld [vmem:[#allocation7 + $0x40] sm:$0xff]  }
  0x9f   : > { %3657 = vmatpush3.bf16.msra.mxu0 %v4101_v37  ;;  %1630 = vperm.xlu0 %4044, %v467_v39  }
  0xa0   : > { %708 = vmatmul.mubr.bf16.gmra.mrb[8].mxu0 %v4054_v10  ;;  %772 = vmatmul.mubr.bf16.gmra.mrb[8].mxu1 %v4075_v11  ;;  %v482_v10 = vld [vmem:[%s4725_s14 + $0xf8] sm:$0xff]  ;;  %v481_v11 = vld [vmem:[%s4725_s14 + $0xf0] sm:$0xff] }
  0xa1   : > { %715 = vmatprep.mubr.bf16.mxu0 %v4055_v13  ;;  %779 = vmatprep.mubr.bf16.mxu1 %v4078_v17  ;;  %v4103_v13 = vld [vmem:[#allocation5 + $0x60] sm:$0xff]   ;;  %v4105_v17 = vld [vmem:[#allocation5 + $0x68] sm:$0xff]  }
  0xa2   : > { %1635 = vperm.xlu1 %4045, %v468_v38   ;;  %3514 = vmatprep.subr.bf16.mxu1 %v4102_v12 }
  0xa3   : > { %1640 = vperm.xlu0 %4044, %v469_v49   ;;  %3515 = vmatpush3.bf16.msra.mxu1 %v4102_v12 }
  0xa4   : > { %3658 = vmatprep.subr.bf16.mxu0 %v4103_v13  ;;  %3516 = vmatprep.subr.bf16.mxu1 %v4104_v16 }
  0xa5   : > { %3659 = vmatpush3.bf16.msra.mxu0 %v4103_v13 }
  0xa6   : > { %1645 = vperm.xlu1 %4045, %v470_v47   ;;  %3660 = vmatprep.subr.bf16.mxu0 %v4105_v17 }
  0xa7   : > { %1650 = vperm.xlu0 %4044, %v471_v52   ;;  %3517 = vmatpush3.bf16.msra.mxu1 %v4104_v16 }
  0xa8   : > { %716 = vmatmul.mubr.bf16.gmra.mrb[12].mxu0 %v4057_v26  ;;  %780 = vmatmul.mubr.bf16.gmra.mrb[12].mxu1 %v4081_v28 }
  0xa9   : > { %723 = vmatprep.mubr.bf16.mxu0 %v4058_v30  ;;  %787 = vmatprep.mubr.bf16.mxu1 %v4082_v31 }
  0xaa   : > { %1655 = vperm.xlu1 %4045, %v472_v51   ;;  %3661 = vmatpush3.bf16.msra.mxu0 %v4105_v17 }
  0xab   : > { %1660 = vperm.xlu0 %4044, %v473_v58   ;;  %3518 = vmatprep.subr.bf16.mxu1 %v4106_v18 }
  0xac   : > { %3519 = vmatpush3.bf16.msra.mxu1 %v4106_v18  ;;  %3662 = vmatprep.subr.bf16.mxu0 %v4107_v19 }
  0xad   : > { %3520 = vmatprep.subr.bf16.mxu1 %v4108_v22 }
  0xae   : > { %1665 = vperm.xlu1 %4045, %v474_v57   ;;  %3663 = vmatpush3.bf16.msra.mxu0 %v4107_v19 }
  0xaf   : > { %1670 = vperm.xlu0 %4044, %v475_v60   ;;  %3664 = vmatprep.subr.bf16.mxu0 %v4109_v23 }
  0xb0   : > { %724 = vmatmul.mubr.bf16.gmra.mrb[16].mxu0 %v4063_v41  ;;  %788 = vmatmul.mubr.bf16.gmra.mrb[16].mxu1 %v4084_v42 }
  0xb1   : > { %731 = vmatprep.mubr.bf16.mxu0 %v4064_v44  ;;  %795 = vmatprep.mubr.bf16.mxu1 %v4085_v45 }
  0xb2   : > { %1675 = vperm.xlu1 %4045, %v476_v59   ;;  %3521 = vmatpush3.bf16.msra.mxu1 %v4108_v22 }
  0xb3   : > { %1680 = vperm.xlu0 %4044, %v477_v2   ;;  %3665 = vmatpush3.bf16.msra.mxu0 %v4109_v23 }
  0xb4   : > { %3554 = vmatprep.subr.bf16.mxu1 %v4826_v35 }
  0xb6   : > { %1685 = vperm.xlu1 %4045, %v478_v1  }
  0xb7   : > { %1690 = vperm.xlu0 %4044, %v479_v5  }
  0xb8   : > { %732 = vmatmul.mubr.bf16.gmra.mrb[20].mxu0 %v4068_v53  ;;  %796 = vmatmul.mubr.bf16.gmra.mrb[20].mxu1 %v4087_v54 }
  0xb9   : > { %739 = vmatprep.mubr.bf16.mxu0 %v4780_v55  ;;  %803 = vmatprep.mubr.bf16.mxu1 %v4088_v56 }
  0xba   : > { %1695 = vperm.xlu1 %4045, %v480_v3  }
  0xbb   : > { %1700 = vperm.xlu0 %4044, %v481_v11  }
  0xbe   : > { %1705 = vperm.xlu1 %4045, %v482_v10  }
  0xc0   : > { %740 = vmatmul.mubr.bf16.gmra.mrb[24].mxu0 %v4789_v61  ;;  %804 = vmatmul.mubr.bf16.gmra.mrb[24].mxu1 %v4792_v62 }
  0xc1   : > { %747 = vmatprep.mubr.bf16.mxu0 %v4795_v63  ;;  %811 = vmatprep.mubr.bf16.mxu1 %v4798_v0 }
  0xc8   : > { %748 = vmatmul.mubr.bf16.gmra.mrb[28].mxu0 %v4809_v6  ;;  %812 = vmatmul.mubr.bf16.gmra.mrb[28].mxu1 %v4812_v7 }
  0xfa   : > { %v1551_v24 = vpop.permute.xlu0 %1550 }
  0xfb   : > { %v1561_v25 = vpop.permute.xlu1 %1560 }
  0xfe   : > { %v1556_v26 = vpop.permute.xlu0 %1555 }
  0xff   : > { %v1566_v28 = vpop.permute.xlu1 %1565 }
 0x102   : > { %v4818_v30 = vpop.permute.xlu0 %1570 }
 0x103   : > { %v4820_v31 = vpop.permute.xlu1 %1575 }
 0x106   : > { %v4822_v32 = vpop.permute.xlu0 %1580 }
 0x107   : > { %v4824_v33 = vpop.permute.xlu1 %1585 }
 0x10a   : > { %v4829_v37 = vpop.permute.xlu0 %1590 }
 0x10b   : > { %v4831_v38 = vpop.permute.xlu1 %1595 }
 0x10e   : > { %v4833_v39 = vpop.permute.xlu0 %1600 }
 0x113   : > { %v4835_v41 = vpop.permute.xlu1 %1605  ;;  %v4839_v44 = vpop.permute.xlu0 %1610 }
 0x119   : > { %v4837_v42 = vpop.permute.xlu1 %1615 }
 0x11a   : > { %v4843_v47 = vpop.permute.xlu0 %1620 }
 0x11d   : > { %v4841_v45 = vpop.permute.xlu1 %1625 }
 0x11e   : > { %v1631_v51 = vpop.permute.xlu0 %1630 }
 0x121   : > { %v1636_v49 = vpop.permute.xlu1 %1635 }
 0x122   : > { %v1641_v19 = vpop.permute.xlu0 %1640 }
 0x125   : > { %v1646_v18 = vpop.permute.xlu1 %1645 }
 0x163   : > { %v3154_v52 = vpop.f32.mrb[0].mxu0  ;;  %v3202_v53 = vpop.f32.mrb[0].mxu1 }
 0x164   : > { %v3155_v54 = vpop.f32.mrb[1].mxu0  ;;  %v3203_v56 = vpop.f32.mrb[1].mxu1 }
 0x165   : > { %v3156_v57 = vadd.f32 %v3155_v54, %v3154_v52  ;;  %v3157_v58 = vpop.f32.mrb[2].mxu0  ;;  %v4845_v59 = vadd.f32 %v3203_v56, %v3202_v53  ;;  %v3205_v60 = vpop.f32.mrb[2].mxu1 }
 0x166   : > { %v3158_v1 = vpop.f32.mrb[3].mxu0  ;;  %v3206_v2 = vpop.f32.mrb[3].mxu1 }
 0x167   : > { %v3159_v3 = vadd.f32 %v3158_v1, %v3157_v58  ;;  %v4847_v5 = vadd.f32 %v3206_v2, %v3205_v60  ;;  %v4850_v10 = vmul.f32 %v4845_v59, %v1631_v51  ;;  %v1708_v11 = vmul.f32 %v3156_v57, %v1551_v24 }
 0x169   : > { %v820_v12 = vpack.c.bf16 %v3159_v3, %v3156_v57  ;;  %v1709_v13 = vmul.f32 %v3159_v3, %v1556_v26  ;;  %v4855_v17 = vmul.f32 %v4847_v5, %v1636_v49 }
 0x16b   : > { %v1740_v22 = vpack.c.bf16 %v1709_v13, %v1708_v11  ;;  %v3160_v23 = vpop.f32.mrb[4].mxu0  ;;  %3522 = vmatprep.mubr.bf16.mxu1 %v820_v12  ;;  %v3208_v53 = vpop.f32.mrb[4].mxu1 }
 0x16c   : > { %v3161_v51 = vpop.f32.mrb[5].mxu0  ;;  %v3209_v54 = vpop.f32.mrb[5].mxu1 }
 0x16d   : > { %v3162_v24 = vadd.f32 %v3161_v51, %v3160_v23  ;;  %v3163_v56 = vpop.f32.mrb[6].mxu0  ;;  %3666 = vmatprep.mubr.bf16.mxu0 %v1740_v22  ;;  %v4859_v26 = vadd.f32 %v3209_v54, %v3208_v53  ;;  %v3211_v57 = vpop.f32.mrb[6].mxu1  ;;  %v4111_v22 = vld [vmem:[#allocation7 + $0x48] sm:$0xff]  }
 0x16e   : > { %v3164_v58 = vpop.f32.mrb[7].mxu0  ;;  %v3212_v49 = vpop.f32.mrb[7].mxu1 }
 0x16f   : > { %v3165_v60 = vadd.f32 %v3164_v58, %v3163_v56  ;;  %v4861_v1 = vadd.f32 %v3212_v49, %v3211_v57  ;;  %v4864_v2 = vmul.f32 %v4859_v26, %v1641_v19  ;;  %v1710_v3 = vmul.f32 %v3162_v24, %v1561_v25  ;;  %v1656_v53 = vpop.permute.xlu1 %1655  ;;  %v1651_v51 = vpop.permute.xlu0 %1650  ;;  %v4112_v49 = vld [vmem:[#allocation7 + $0x50] sm:$0xff]  }
 0x171   : > { %v821_v11 = vpack.c.bf16 %v3165_v60, %v3162_v24  ;;  %v1711_v12 = vmul.f32 %v3165_v60, %v1566_v28  ;;  %v4869_v23 = vmul.f32 %v4861_v1, %v1646_v18 }
 0x173   : > { %v1741_v54 = vpack.c.bf16 %v1711_v12, %v1710_v3  ;;  %v3166_v52 = vpop.f32.mrb[8].mxu0  ;;  %3523 = vmatmul.mubr.bf16.vlgmr.msra.gmra.mrb[32].mxu1 %v821_v11  ;;  %v3214_v19 = vpop.f32.mrb[8].mxu1 }
 0x174   : > { %v3167_v57 = vpop.f32.mrb[9].mxu0  ;;  %v3215_v25 = vpop.f32.mrb[9].mxu1  ;;  %3555 = vmatpush3.bf16.msra.mxu1 %v4826_v35 }
 0x175   : > { %v3168_v28 = vadd.f32 %v3167_v57, %v3166_v52  ;;  %v3169_v24 = vpop.f32.mrb[10].mxu0  ;;  %3667 = vmatmul.mubr.bf16.vlgmr.msra.gmra.mrb[32].mxu0 %v1741_v54  ;;  %v4874_v58 = vadd.f32 %v3215_v25, %v3214_v19  ;;  %v3217_v18 = vpop.f32.mrb[10].mxu1  ;;  %3556 = vmatprep.subr.bf16.mxu1 %v4111_v22  ;;  %v4113_v57 = vld [vmem:[#allocation7 + $0x58] sm:$0xff]   ;;  %v4114_v54 = vld [vmem:[#allocation7 + $0x60] sm:$0xff]  }
 0x176   : > { %v3170_v60 = vpop.f32.mrb[11].mxu0  ;;  %v3218_v3 = vpop.f32.mrb[11].mxu1 }
 0x177   : > { %v3171_v12 = vadd.f32 %v3170_v60, %v3169_v24  ;;  %v4876_v11 = vadd.f32 %v3218_v3, %v3217_v18  ;;  %v4879_v56 = vmul.f32 %v4874_v58, %v1651_v51  ;;  %v1712_v13 = vmul.f32 %v3168_v28, %v4818_v30  ;;  %v1666_v25 = vpop.permute.xlu1 %1665  ;;  %v1661_v24 = vpop.permute.xlu0 %1660 }
 0x178   : > { %3557 = vmatpush3.bf16.msra.mxu1 %v4111_v22 }
 0x179   : > { %v822_v35 = vpack.c.bf16 %v3171_v12, %v3168_v28  ;;  %v1713_v52 = vmul.f32 %v3171_v12, %v4820_v31  ;;  %v4886_v19 = vmul.f32 %v4876_v11, %v1656_v53  ;;  %3558 = vmatprep.subr.bf16.mxu1 %v4112_v49 }
 0x17b   : > { %v1742_v18 = vpack.c.bf16 %v1713_v52, %v1712_v13  ;;  %v3172_v60 = vpop.f32.mrb[12].mxu0  ;;  %3526 = vmatprep.mubr.bf16.mxu1 %v822_v35  ;;  %v3220_v51 = vpop.f32.mrb[12].mxu1 }
 0x17c   : > { %v3173_v22 = vpop.f32.mrb[13].mxu0  ;;  %v3221_v28 = vpop.f32.mrb[13].mxu1  ;;  %3559 = vmatpush3.bf16.msra.mxu1 %v4112_v49 }
 0x17d   : > { %v3174_v31 = vadd.f32 %v3173_v22, %v3172_v60  ;;  %v3175_v3 = vpop.f32.mrb[14].mxu0  ;;  %3670 = vmatprep.mubr.bf16.mxu0 %v1742_v18  ;;  %v4890_v12 = vadd.f32 %v3221_v28, %v3220_v51  ;;  %v3223_v53 = vpop.f32.mrb[14].mxu1  ;;  %3560 = vmatprep.subr.bf16.mxu1 %v4113_v57  ;;  %v4115_v22 = vld [vmem:[#allocation7 + $0x68] sm:$0xff]  }
 0x17e   : > { %v3176_v16 = vpop.f32.mrb[15].mxu0  ;;  %v3224_v48 = vpop.f32.mrb[15].mxu1 }
 0x17f   : > { %v3177_v13 = vadd.f32 %v3176_v16, %v3175_v3  ;;  %v4892_v52 = vadd.f32 %v3224_v48, %v3223_v53  ;;  %v4895_v35 = vmul.f32 %v4890_v12, %v1661_v24  ;;  %v1714_v30 = vmul.f32 %v3174_v31, %v4822_v32  ;;  %v1676_v16 = vpop.permute.xlu1 %1675  ;;  %v1671_v48 = vpop.permute.xlu0 %1670 }
 0x180   : > { %3561 = vmatpush3.bf16.msra.mxu1 %v4113_v57 }
 0x181   : > { %v823_v49 = vpack.c.bf16 %v3177_v13, %v3174_v31  ;;  %v1715_v60 = vmul.f32 %v3177_v13, %v4824_v33  ;;  %v4902_v51 = vmul.f32 %v4892_v52, %v1666_v25  ;;  %3562 = vmatprep.subr.bf16.mxu1 %v4114_v54 }
 0x183   : > { %v1743_v28 = vpack.c.bf16 %v1715_v60, %v1714_v30  ;;  %v3178_v3 = vpop.f32.mrb[16].mxu0  ;;  %3527 = vmatmul.mubr.bf16.gmra.mrb[36].mxu1 %v823_v49  ;;  %v3226_v24 = vpop.f32.mrb[16].mxu1 }
 0x184   : > { %v3179_v57 = vpop.f32.mrb[17].mxu0  ;;  %v3227_v31 = vpop.f32.mrb[17].mxu1  ;;  %3563 = vmatpush3.bf16.msra.mxu1 %v4114_v54 }
 0x185   : > { %v3180_v33 = vadd.f32 %v3179_v57, %v3178_v3  ;;  %v3181_v53 = vpop.f32.mrb[18].mxu0  ;;  %3671 = vmatmul.mubr.bf16.gmra.mrb[36].mxu0 %v1743_v28  ;;  %v4906_v13 = vadd.f32 %v3227_v31, %v3226_v24  ;;  %v3229_v25 = vpop.f32.mrb[18].mxu1  ;;  %3564 = vmatprep.subr.bf16.mxu1 %v4115_v22 }
 0x186   : > { %v3182_v18 = vpop.f32.mrb[19].mxu0  ;;  %v3230_v43 = vpop.f32.mrb[19].mxu1 }
 0x187   : > { %v3183_v36 = vadd.f32 %v3182_v18, %v3181_v53  ;;  %v4908_v30 = vadd.f32 %v3230_v43, %v3229_v25  ;;  %v4911_v49 = vmul.f32 %v4906_v13, %v1671_v48  ;;  %v1716_v60 = vmul.f32 %v3180_v33, %v4829_v37  ;;  %v1686_v24 = vpop.permute.xlu1 %1685  ;;  %v1681_v57 = vpop.permute.xlu0 %1680 }
 0x188   : > { %3565 = vmatpush3.bf16.msra.mxu1 %v4115_v22 }
 0x189   : > { %v824_v32 = vpack.c.bf16 %v3183_v36, %v3180_v33  ;;  %v1717_v54 = vmul.f32 %v3183_v36, %v4831_v38  ;;  %v4918_v3 = vmul.f32 %v4908_v30, %v1676_v16 }
 0x18b   : > { %v1744_v18 = vpack.c.bf16 %v1717_v54, %v1716_v60  ;;  %v3184_v43 = vpop.f32.mrb[20].mxu0  ;;  %3530 = vmatprep.mubr.bf16.mxu1 %v824_v32  ;;  %v3232_v31 = vpop.f32.mrb[20].mxu1 }
 0x18c   : > { %v3185_v37 = vpop.f32.mrb[21].mxu0  ;;  %v3233_v22 = vpop.f32.mrb[21].mxu1 }
 0x18d   : > { %v3186_v33 = vadd.f32 %v3185_v37, %v3184_v43  ;;  %v3187_v53 = vpop.f32.mrb[22].mxu0  ;;  %3674 = vmatprep.mubr.bf16.mxu0 %v1744_v18  ;;  %v4922_v36 = vadd.f32 %v3233_v22, %v3232_v31  ;;  %v3235_v38 = vpop.f32.mrb[22].mxu1 }
 0x18e   : > { %v3188_v25 = vpop.f32.mrb[23].mxu0  ;;  %v3236_v16 = vpop.f32.mrb[23].mxu1 }
 0x18f   : > { %v3189_v28 = vadd.f32 %v3188_v25, %v3187_v53  ;;  %v4924_v29 = vadd.f32 %v3236_v16, %v3235_v38  ;;  %v4927_v60 = vmul.f32 %v4922_v36, %v1681_v57  ;;  %v1718_v32 = vmul.f32 %v3186_v33, %v4833_v39  ;;  %v1696_v31 = vpop.permute.xlu1 %1695  ;;  %v1691_v37 = vpop.permute.xlu0 %1690 }
 0x191   : > { %v825_v54 = vpack.c.bf16 %v3189_v28, %v3186_v33  ;;  %v1719_v48 = vmul.f32 %v3189_v28, %v4835_v41  ;;  %v4934_v18 = vmul.f32 %v4924_v29, %v1686_v24 }
 0x193   : > { %v1745_v22 = vpack.c.bf16 %v1719_v48, %v1718_v32  ;;  %v3190_v53 = vpop.f32.mrb[24].mxu0  ;;  %3531 = vmatmul.mubr.bf16.gmra.mrb[40].mxu1 %v825_v54  ;;  %v3238_v38 = vpop.f32.mrb[24].mxu1  ;;  %v1753_v57 = vpack.c.bf16 %v4934_v18, %v4927_v60 }
 0x194   : > { %v3191_v25 = vpop.f32.mrb[25].mxu0  ;;  %v3239_v39 = vpop.f32.mrb[25].mxu1 }
 0x195   : > { %v3192_v33 = vadd.f32 %v3191_v25, %v3190_v53  ;;  %v3193_v16 = vpop.f32.mrb[26].mxu0  ;;  %3675 = vmatmul.mubr.bf16.gmra.mrb[40].mxu0 %v1745_v22  ;;  %v3240_v41 = vadd.f32 %v3239_v39, %v3238_v38  ;;  %v3241_v28 = vpop.f32.mrb[26].mxu1 }
 0x196   : > { %v3194_v43 = vpop.f32.mrb[27].mxu0  ;;  %v3242_v21 = vpop.f32.mrb[27].mxu1 }
 0x197   : > { %v3195_v24 = vadd.f32 %v3194_v43, %v3193_v16  ;;  %v3243_v15 = vadd.f32 %v3242_v21, %v3241_v28  ;;  %v1736_v9 = vmul.f32 %v3240_v41, %v1691_v37  ;;  %v1720_v48 = vmul.f32 %v3192_v33, %v4839_v44  ;;  %v1706_v60 = vpop.permute.xlu1 %1705  ;;  %v1701_v18 = vpop.permute.xlu0 %1700 }
 0x199   : > { %v826_v32 = vpack.c.bf16 %v3195_v24, %v3192_v33  ;;  %v1721_v54 = vmul.f32 %v3195_v24, %v4837_v42  ;;  %v834_v4 = vpack.c.bf16 %v3243_v15, %v3240_v41  ;;  %v1737_v50 = vmul.f32 %v3243_v15, %v1696_v31 }
 0x19b   : > { %v3196_v46 = vpop.f32.mrb[28].mxu0  ;;  %3534 = vmatprep.mubr.bf16.mxu1 %v826_v32  ;;  %v1746_v53 = vpack.c.bf16 %v1721_v54, %v1720_v48  ;;  %v3244_v22 = vpop.f32.mrb[28].mxu1  ;;  %v1754_v38 = vpack.c.bf16 %v1737_v50, %v1736_v9  ;;  %v5374_v32 = vpack.c.bf16 %v4855_v17, %v4850_v10  ;;  %v5380_v10 = vpack.c.bf16 %v4908_v30, %v4906_v13  ;;  %v4986_v13 = vld [vmem:[%s4614_s21 + $0x10] sm:$0xff]  ;;  %v4998_v54 = vld [vmem:[%s4614_s21 + $0x8] sm:$0xff] }
 0x19c   : > { %v3197_v25 = vpop.f32.mrb[29].mxu0  ;;  %v3245_v39 = vpop.f32.mrb[29].mxu1  ;;  %v5381_v17 = vpack.c.bf16 %v4902_v51, %v4895_v35 }
 0x19d   : > { %v3198_v40 = vadd.f32 %v3197_v25, %v3196_v46  ;;  %v3199_v43 = vpop.f32.mrb[30].mxu0  ;;  %3678 = vmatprep.mubr.bf16.mxu0 %v1746_v53  ;;  %v3246_v21 = vadd.f32 %v3245_v39, %v3244_v22  ;;  %v3247_v37 = vpop.f32.mrb[30].mxu1  ;;  %v5373_v46 = vpack.c.bf16 %v4847_v5, %v4845_v59  ;;  %v5378_v59 = vpack.c.bf16 %v4886_v19, %v4879_v56  ;;  %v4117_v56 = vld [vmem:[#allocation7 + $0x78] sm:$0xff]  }
 0x19e   : > { %v3200_v44 = vpop.f32.mrb[31].mxu0  ;;  %v3248_v33 = vpop.f32.mrb[31].mxu1  ;;  %v5379_v5 = vpack.c.bf16 %v4892_v52, %v4890_v12 }
 0x19f   : > { %v3201_v16 = vadd.f32 %v3200_v44, %v3199_v43  ;;  %v3249_v42 = vadd.f32 %v3248_v33, %v3247_v37  ;;  %v1738_v41 = vmul.f32 %v3246_v21, %v1701_v18  ;;  %v1722_v15 = vmul.f32 %v3198_v40, %v4843_v47  ;;  %v4147_v33 = vld [vmem:[%s4614_s21 + $0x30] sm:$0xff] }
 0x1a0   : > { %v5377_v47 = vpack.c.bf16 %v4869_v23, %v4864_v2  ;;  %v4142_v2 = vld [vmem:[%s4662_s22 + $0x4] ss:$8 sps:$4 sm:$0xff]   ;;  %v4116_v23 = vld [vmem:[#allocation7 + $0x70] sm:$0xff]  }
 0x1a1   : > { %v827_v31 = vpack.c.bf16 %v3201_v16, %v3198_v40  ;;  %v1723_v28 = vmul.f32 %v3201_v16, %v4841_v45  ;;  %v835_v24 = vpack.c.bf16 %v3249_v42, %v3246_v21  ;;  %v1739_v48 = vmul.f32 %v3249_v42, %v1706_v60  ;;  %3566 = vmatprep.subr.bf16.mxu1 %v4116_v23  ;;  %v4148_v42 = vld [vmem:[%s4614_s21 + $0x38] sm:$0xff] }
 0x1a2   : > { %v5375_v40 = vpack.c.bf16 %v4861_v1, %v4859_v26  ;;  %v5376_v45 = vpack.c.bf16 %v4876_v11, %v4874_v58  ;;  %v5382_v26 = vpack.c.bf16 %v4918_v3, %v4911_v49  ;;  %v5383_v1 = vpack.c.bf16 %v4924_v29, %v4922_v36  ;;  %3567 = vmatpush3.bf16.msra.mxu1 %v4116_v23  ;;  %v4990_v49 = vld [vmem:[%s4614_s21 + $0x18] sm:$0xff]  ;;  %v4994_v36 = vld [vmem:[%s4614_s21] sm:$0xff] }
 0x1a3   : > { %3535 = vmatmul.mubr.bf16.gmra.mrb[44].mxu1 %v827_v31  ;;  %v1747_v9 = vpack.c.bf16 %v1723_v28, %v1722_v15  ;;  %v1755_v50 = vpack.c.bf16 %v1739_v48, %v1738_v41  ;;  %3568 = vmatprep.subr.bf16.mxu1 %v4117_v56  ;;  %v4149_v15 = vld [vmem:[%s4614_s21 + $0x20] sm:$0xff]  ;;  %v4150_v28 = vld [vmem:[%s4614_s21 + $0x28] sm:$0xff] }
 0x1a4   : > { %3538 = vmatprep.mubr.bf16.mxu1 %v5373_v46 }
 0x1a5   : > { %3679 = vmatmul.mubr.bf16.gmra.mrb[44].mxu0 %v1747_v9 }
 0x1a6   : > { %3682 = vmatprep.mubr.bf16.mxu0 %v5374_v32  ;;  %3569 = vmatpush3.bf16.msra.mxu1 %v4117_v56  ;;  %v4154_v56 = vld [vmem:[%s4614_s21 + $0x48] sm:$0xff] }
 0x1ab   : > { %3539 = vmatmul.mubr.bf16.gmra.mrb[48].mxu1 %v5375_v40 }
 0x1ac   : > { %3542 = vmatprep.mubr.bf16.mxu1 %v5376_v45 }
 0x1ad   : > { %3683 = vmatmul.mubr.bf16.gmra.mrb[48].mxu0 %v5377_v47 }
 0x1ae   : > { %3686 = vmatprep.mubr.bf16.mxu0 %v5378_v59 }
 0x1b3   : > { %3543 = vmatmul.mubr.bf16.gmra.mrb[52].mxu1 %v5379_v5 }
 0x1b4   : > { %3546 = vmatprep.mubr.bf16.mxu1 %v5380_v10  ;;  %v4151_v10 = vld [vmem:[%s4614_s21 + $0x50] sm:$0xff] }
 0x1b5   : > { %3687 = vmatmul.mubr.bf16.gmra.mrb[52].mxu0 %v5381_v17 }
 0x1b6   : > { %3690 = vmatprep.mubr.bf16.mxu0 %v5382_v26  ;;  %v4152_v26 = vld [vmem:[%s4614_s21 + $0x58] sm:$0xff] }
 0x1bb   : > { %3547 = vmatmul.mubr.bf16.gmra.mrb[56].mxu1 %v5383_v1 }
 0x1bc   : > { %3550 = vmatprep.mubr.bf16.mxu1 %v834_v4  ;;  %v4979_v4 = vld [vmem:[%s5334_s4] ss:$0 sm:$0xff] }
 0x1bd   : > { %3691 = vmatmul.mubr.bf16.gmra.mrb[56].mxu0 %v1753_v57 }
 0x1be   : > { %3694 = vmatprep.mubr.bf16.mxu0 %v1754_v38 }
 0x1c3   : > { %3551 = vmatmul.mubr.bf16.gmra.mrb[60].mxu1 %v835_v24 }
 0x1c5   : > { %3695 = vmatmul.mubr.bf16.gmra.mrb[60].mxu0 %v1755_v50 }
 0x1c6   : > { %2019 = vmatprep.mubr.bf16.mxu0 %v4142_v2  ;;  %v4153_v2 = vld [vmem:[%s4614_s21 + $0x40] sm:$0xff] }
 0x246   : > { %v3524_v29 = vpop.f32.mrb[32].mxu1 }
 0x247   : > { %v948_v58 = vadd.f32 %v3524_v29, %v4979_v4  ;;  %v939_v11 = vpop.f32.mrb[33].mxu1 }
 0x248   : > { %v940_v19 = vadd.f32 %v4979_v4, %v939_v11  ;;  %v3525_v12 = vpop.f32.mrb[34].mxu1 }
 0x249   : > { %v951_v52 = vadd.f32 %v3525_v12, %v4979_v4  ;;  %v942_v35 = vpop.f32.mrb[35].mxu1  ;;  %v1068_v30 = vadd.f32 %v4986_v13, %v948_v58 }
 0x24a   : > { %v943_v51 = vadd.f32 %v4979_v4, %v942_v35  ;;  %v1066_v57 = vadd.f32 %v4994_v36, %v940_v19 }
 0x24b   : > { %v1069_v3 = vadd.f32 %v4990_v49, %v951_v52 }
 0x24c   : > { %v1067_v60 = vadd.f32 %v4998_v54, %v943_v51 }
 0x24d   : > { %v5001_v18 = vpack.c.bf16 %v1069_v3, %v1068_v30 }
 0x24e   : > { %v5003_v53 = vpack.c.bf16 %v1067_v60, %v1066_v57  ;;  %v4155_v60 = vld [vmem:[%s4614_s21 + $0x70] sm:$0xff] }
 0x250   : > { %3570 = vmatprep.mubr.bf16.mxu1 %v5003_v53 }
 0x251   : > { %3571 = vmatmul.mubr.bf16.vlgmr.msra.gmra.mrb[64].mxu1 %v5001_v18 }
 0x256   : > { %v3528_v22 = vpop.f32.mrb[36].mxu1 }
 0x257   : > { %v964_v38 = vadd.f32 %v3528_v22, %v4979_v4  ;;  %v955_v25 = vpop.f32.mrb[37].mxu1 }
 0x258   : > { %v956_v39 = vadd.f32 %v4979_v4, %v955_v25  ;;  %v3529_v43 = vpop.f32.mrb[38].mxu1 }
 0x259   : > { %v967_v21 = vadd.f32 %v3529_v43, %v4979_v4  ;;  %v958_v37 = vpop.f32.mrb[39].mxu1  ;;  %v1072_v16 = vadd.f32 %v4147_v33, %v964_v38  ;;  %v4156_v38 = vld [vmem:[%s4614_s21 + $0x78] sm:$0xff] }
 0x25a   : > { %v959_v44 = vadd.f32 %v4979_v4, %v958_v37  ;;  %v1070_v31 = vadd.f32 %v4149_v15, %v956_v39  ;;  %v4157_v39 = vld [vmem:[%s4614_s21 + $0x60] sm:$0xff] }
 0x25b   : > { %v1073_v41 = vadd.f32 %v4148_v42, %v967_v21  ;;  %v4158_v21 = vld [vmem:[%s4614_s21 + $0x68] sm:$0xff] }
 0x25c   : > { %v1071_v24 = vadd.f32 %v4150_v28, %v959_v44 }
 0x25d   : > { %v5015_v48 = vpack.c.bf16 %v1073_v41, %v1072_v16 }
 0x25e   : > { %v5017_v9 = vpack.c.bf16 %v1071_v24, %v1070_v31 }
 0x260   : > { %3574 = vmatprep.mubr.bf16.mxu1 %v5017_v9 }
 0x261   : > { %3575 = vmatmul.mubr.bf16.gmra.mrb[68].mxu1 %v5015_v48 }
 0x266   : > { %v3532_v50 = vpop.f32.mrb[40].mxu1 }
 0x267   : > { %v980_v46 = vadd.f32 %v3532_v50, %v4979_v4  ;;  %v971_v32 = vpop.f32.mrb[41].mxu1 }
 0x268   : > { %v972_v40 = vadd.f32 %v4979_v4, %v971_v32  ;;  %v3533_v45 = vpop.f32.mrb[42].mxu1 }
 0x269   : > { %v983_v47 = vadd.f32 %v3533_v45, %v4979_v4  ;;  %v974_v59 = vpop.f32.mrb[43].mxu1  ;;  %v1076_v17 = vadd.f32 %v4151_v10, %v980_v46  ;;  %v4159_v46 = vld [vmem:[%s4614_s21 + $0x90] sm:$0xff] }
 0x26a   : > { %v975_v5 = vadd.f32 %v4979_v4, %v974_v59  ;;  %v1074_v23 = vadd.f32 %v4153_v2, %v972_v40  ;;  %v4160_v40 = vld [vmem:[%s4614_s21 + $0x98] sm:$0xff] }
 0x26b   : > { %v1077_v1 = vadd.f32 %v4152_v26, %v983_v47  ;;  %v4161_v47 = vld [vmem:[%s4614_s21 + $0x80] sm:$0xff] }
 0x26c   : > { %v1075_v29 = vadd.f32 %v4154_v56, %v975_v5  ;;  %v4162_v5 = vld [vmem:[%s4614_s21 + $0x88] sm:$0xff] }
 0x26d   : > { %v5029_v58 = vpack.c.bf16 %v1077_v1, %v1076_v17 }
 0x26e   : > { %v5031_v11 = vpack.c.bf16 %v1075_v29, %v1074_v23 }
 0x270   : > { %3578 = vmatprep.mubr.bf16.mxu1 %v5031_v11 }
 0x271   : > { %3579 = vmatmul.mubr.bf16.gmra.mrb[72].mxu1 %v5029_v58 }
 0x276   : > { %v3536_v19 = vpop.f32.mrb[44].mxu1 }
 0x277   : > { %v996_v12 = vadd.f32 %v3536_v19, %v4979_v4  ;;  %v987_v52 = vpop.f32.mrb[45].mxu1 }
 0x278   : > { %v988_v35 = vadd.f32 %v4979_v4, %v987_v52  ;;  %v3537_v51 = vpop.f32.mrb[46].mxu1 }
 0x279   : > { %v999_v30 = vadd.f32 %v3537_v51, %v4979_v4  ;;  %v990_v3 = vpop.f32.mrb[47].mxu1  ;;  %v1080_v22 = vadd.f32 %v4155_v60, %v996_v12 }
 0x27a   : > { %v991_v57 = vadd.f32 %v4979_v4, %v990_v3  ;;  %v1078_v43 = vadd.f32 %v4157_v39, %v988_v35  ;;  %v4163_v35 = vld [vmem:[%s4614_s21 + $0xb0] sm:$0xff] }
 0x27b   : > { %v1081_v25 = vadd.f32 %v4156_v38, %v999_v30  ;;  %v4164_v30 = vld [vmem:[%s4614_s21 + $0xb8] sm:$0xff] }
 0x27c   : > { %v1079_v37 = vadd.f32 %v4158_v21, %v991_v57  ;;  %v4165_v57 = vld [vmem:[%s4614_s21 + $0xa0] sm:$0xff] }
 0x27d   : > { %v5043_v44 = vpack.c.bf16 %v1081_v25, %v1080_v22  ;;  %v4166_v22 = vld [vmem:[%s4614_s21 + $0xa8] sm:$0xff] }
 0x27e   : > { %v3540_v33 = vpop.f32.mrb[48].mxu1  ;;  %v5045_v16 = vpack.c.bf16 %v1079_v37, %v1078_v43 }
 0x27f   : > { %v1012_v42 = vadd.f32 %v3540_v33, %v4979_v4  ;;  %v1003_v41 = vpop.f32.mrb[49].mxu1 }
 0x280   : > { %v1004_v15 = vadd.f32 %v4979_v4, %v1003_v41  ;;  %v3541_v31 = vpop.f32.mrb[50].mxu1  ;;  %3582 = vmatprep.mubr.bf16.mxu1 %v5045_v16 }
 0x281   : > { %v1015_v28 = vadd.f32 %v3541_v31, %v4979_v4  ;;  %v1006_v24 = vpop.f32.mrb[51].mxu1  ;;  %3583 = vmatmul.mubr.bf16.gmra.mrb[76].mxu1 %v5043_v44  ;;  %v1084_v32 = vadd.f32 %v4159_v46, %v1012_v42 }
 0x282   : > { %v1007_v50 = vadd.f32 %v4979_v4, %v1006_v24  ;;  %v1082_v59 = vadd.f32 %v4161_v47, %v1004_v15  ;;  %v4167_v15 = vld [vmem:[%s4614_s21 + $0xd0] sm:$0xff] }
 0x283   : > { %v1085_v45 = vadd.f32 %v4160_v40, %v1015_v28  ;;  %v4168_v28 = vld [vmem:[%s4614_s21 + $0xd8] sm:$0xff] }
 0x284   : > { %v1083_v10 = vadd.f32 %v4162_v5, %v1007_v50  ;;  %v4169_v50 = vld [vmem:[%s4614_s21 + $0xc0] sm:$0xff] }
 0x285   : > { %v1107_v17 = vpack.c.bf16 %v1085_v45, %v1084_v32  ;;  %v4170_v32 = vld [vmem:[%s4614_s21 + $0xc8] sm:$0xff] }
 0x286   : > { %v3544_v26 = vpop.f32.mrb[52].mxu1  ;;  %v1106_v1 = vpack.c.bf16 %v1083_v10, %v1082_v59 }
 0x287   : > { %v1028_v2 = vadd.f32 %v3544_v26, %v4979_v4  ;;  %v1019_v23 = vpop.f32.mrb[53].mxu1 }
 0x288   : > { %v1020_v56 = vadd.f32 %v4979_v4, %v1019_v23  ;;  %v3545_v29 = vpop.f32.mrb[54].mxu1  ;;  %3586 = vmatprep.mubr.bf16.mxu1 %v1106_v1  ;;  %3346 = vmatprep.subr.bf16.mxu0 %v1106_v1 }
 0x289   : > { %v1031_v19 = vadd.f32 %v3545_v29, %v4979_v4  ;;  %v1022_v12 = vpop.f32.mrb[55].mxu1  ;;  %3587 = vmatmul.mubr.bf16.gmra.mrb[80].mxu1 %v1107_v17  ;;  %3347 = vmatpush3.bf16.msra.mxu0 %v5003_v53  ;;  %v1088_v51 = vadd.f32 %v4163_v35, %v1028_v2  ;;  %v4171_v2 = vld [vmem:[%s4614_s21 + $0xf0] sm:$0xff] }
 0x28a   : > { %v1023_v52 = vadd.f32 %v4979_v4, %v1022_v12  ;;  %3348 = vmatprep.subr.bf16.mxu0 %v1107_v17  ;;  %v1086_v60 = vadd.f32 %v4165_v57, %v1020_v56  ;;  %v4172_v56 = vld [vmem:[%s4614_s21 + $0xf8] sm:$0xff] }
 0x28b   : > { %v1089_v3 = vadd.f32 %v4164_v30, %v1031_v19  ;;  %v4173_v19 = vld [vmem:[%s4614_s21 + $0xe0] sm:$0xff]  ;;  %v4121_v57 = vld [vmem:[#allocation5 + $0x98] sm:$0xff]  }
 0x28c   : > { %v1087_v38 = vadd.f32 %v4166_v22, %v1023_v52  ;;  %v4174_v52 = vld [vmem:[%s4614_s21 + $0xe8] sm:$0xff] }
 0x28d   : > { %3349 = vmatpush3.bf16.msra.mxu0 %v5001_v18  ;;  %v1109_v25 = vpack.c.bf16 %v1089_v3, %v1088_v51  ;;  %v4175_v3 = vld [vmem:[%s4662_s22] ss:$8 sps:$4 sm:$0xff]  }
 0x28e   : > { %v3548_v39 = vpop.f32.mrb[56].mxu1  ;;  %v1108_v43 = vpack.c.bf16 %v1087_v38, %v1086_v60  ;;  %v4177_v60 = vld [vmem:[%s4662_s22 + $0x10] ss:$8 sps:$4 sm:$0xff]   ;;  %v4179_v22 = vld [vmem:[%s4662_s22 + $0x20] ss:$8 sps:$4 sm:$0xff]  }
 0x28f   : > { %v1044_v53 = vadd.f32 %v3548_v39, %v4979_v4  ;;  %v1035_v21 = vpop.f32.mrb[57].mxu1  ;;  %v4180_v38 = vld [vmem:[%s4662_s22 + $0x34] ss:$8 sps:$4 sm:$0xff]   ;;  %v4182_v39 = vld [vmem:[%s4662_s22 + $0x44] ss:$8 sps:$4 sm:$0xff]  }
 0x290   : > { %v1036_v37 = vadd.f32 %v4979_v4, %v1035_v21  ;;  %v3549_v33 = vpop.f32.mrb[58].mxu1  ;;  %3350 = vmatprep.subr.bf16.mxu0 %v1108_v43  ;;  %3590 = vmatprep.mubr.bf16.mxu1 %v1108_v43  ;;  %v4183_v43 = vld [vmem:[%s4662_s22 + $0x40] ss:$8 sps:$4 sm:$0xff]   ;;  %v4185_v21 = vld [vmem:[%s4662_s22 + $0x50] ss:$8 sps:$4 sm:$0xff]  }
 0x291   : > { %v1047_v42 = vadd.f32 %v3549_v33, %v4979_v4  ;;  %v1038_v41 = vpop.f32.mrb[59].mxu1  ;;  %3351 = vmatpush3.bf16.msra.mxu0 %v5017_v9  ;;  %3591 = vmatmul.mubr.bf16.gmra.mrb[84].mxu1 %v1109_v25  ;;  %v1092_v31 = vadd.f32 %v4167_v15, %v1044_v53  ;;  %v4184_v53 = vld [vmem:[%s4662_s22 + $0x54] ss:$8 sps:$4 sm:$0xff]   ;;  %v4187_v33 = vld [vmem:[%s4662_s22 + $0x80] ss:$8 sps:$4 sm:$0xff]  }
 0x292   : > { %v1039_v18 = vadd.f32 %v4979_v4, %v1038_v41  ;;  %3352 = vmatprep.subr.bf16.mxu0 %v1109_v25  ;;  %v1090_v46 = vadd.f32 %v4169_v50, %v1036_v37  ;;  %v4181_v25 = vld [vmem:[%s4662_s22 + $0x30] ss:$8 sps:$4 sm:$0xff]   ;;  %v4186_v37 = vld [vmem:[%s4662_s22 + $0x84] ss:$8 sps:$4 sm:$0xff]   ;;  %v4196_v50 = vld [vmem:[%s4662_s22 + $0xd4] ss:$8 sps:$4 sm:$0xff]  }
 0x293   : > { %v1093_v24 = vadd.f32 %v4168_v28, %v1047_v42  ;;  %v4188_v42 = vld [vmem:[%s4662_s22 + $0x94] ss:$8 sps:$4 sm:$0xff]   ;;  %v4189_v41 = vld [vmem:[%s4662_s22 + $0x90] ss:$8 sps:$4 sm:$0xff]   ;;  %v4194_v15 = vld [vmem:[%s4662_s22 + $0xc4] ss:$8 sps:$4 sm:$0xff]  }
 0x294   : > { %v1091_v40 = vadd.f32 %v4170_v32, %v1039_v18  ;;  %v4190_v18 = vld [vmem:[%s4662_s22 + $0xa4] ss:$8 sps:$4 sm:$0xff]   ;;  %v4125_v28 = vld [vmem:[#allocation5 + $0xb8] sm:$0xff]  }
 0x295   : > { %3353 = vmatpush3.bf16.msra.mxu0 %v5015_v48  ;;  %v1111_v45 = vpack.c.bf16 %v1093_v24, %v1092_v31  ;;  %v4124_v31 = vld [vmem:[#allocation5 + $0xb0] sm:$0xff]   ;;  %v4195_v24 = vld [vmem:[%s4662_s22 + $0xc0] ss:$8 sps:$4 sm:$0xff]   ;;  %v4198_v32 = vld [vmem:[%s4662_s22 + $0xe4] ss:$8 sps:$4 sm:$0xff]  }
 0x296   : > { %v3552_v47 = vpop.f32.mrb[60].mxu1  ;;  %v1110_v59 = vpack.c.bf16 %v1091_v40, %v1090_v46  ;;  %v4197_v46 = vld [vmem:[%s4662_s22 + $0xd0] ss:$8 sps:$4 sm:$0xff]  }
 0x297   : > { %v1060_v9 = vadd.f32 %v3552_v47, %v4979_v4  ;;  %v1051_v5 = vpop.f32.mrb[61].mxu1  ;;  %v4127_v47 = vld [vmem:[#allocation7 + $0x8] sm:$0xff]  }
 0x298   : > { %v1052_v10 = vadd.f32 %v4979_v4, %v1051_v5  ;;  %v3553_v17 = vpop.f32.mrb[62].mxu1  ;;  %3354 = vmatprep.subr.bf16.mxu0 %v1110_v59  ;;  %3594 = vmatprep.mubr.bf16.mxu1 %v1110_v59 }
 0x299   : > { %v1063_v26 = vadd.f32 %v3553_v17, %v4979_v4  ;;  %v1054_v1 = vpop.f32.mrb[63].mxu1  ;;  %3355 = vmatpush3.bf16.msra.mxu0 %v5031_v11  ;;  %3595 = vmatmul.mubr.bf16.gmra.mrb[88].mxu1 %v1111_v45  ;;  %v1096_v23 = vadd.f32 %v4171_v2, %v1060_v9  ;;  %v4119_v11 = vld [vmem:[#allocation5 + $0x88] sm:$0xff]  }
 0x29a   : > { %v1055_v48 = vadd.f32 %v4979_v4, %v1054_v1  ;;  %3356 = vmatprep.subr.bf16.mxu0 %v1111_v45  ;;  %v1094_v12 = vadd.f32 %v4173_v19, %v1052_v10  ;;  %v4118_v4 = vld [vmem:[#allocation5 + $0x80] sm:$0xff]  }
 0x29b   : > { %v1097_v29 = vadd.f32 %v4172_v56, %v1063_v26  ;;  %v4126_v45 = vld [vmem:[#allocation7] sm:$0xff]   ;;  %v4128_v26 = vld [vmem:[#allocation7 + $0x10] sm:$0xff]  }
 0x29c   : > { %v1095_v35 = vadd.f32 %v4174_v52, %v1055_v48  ;;  %3602 = vmatprep.subr.bf16.mxu1 %v4126_v45  ;;  %v4131_v52 = vld [vmem:[#allocation7 + $0x28] sm:$0xff]  }
 0x29d   : > { %3357 = vmatpush3.bf16.msra.mxu0 %v5029_v58  ;;  %v1113_v51 = vpack.c.bf16 %v1097_v29, %v1096_v23  ;;  %v4176_v58 = vld [vmem:[%s4662_s22 + $0x14] ss:$8 sps:$4 sm:$0xff]   ;;  %3603 = vmatpush3.bf16.msra.mxu1 %v4126_v45  ;;  %v4130_v29 = vld [vmem:[#allocation7 + $0x20] sm:$0xff]  }
 0x29e   : > { %v1112_v30 = vpack.c.bf16 %v1095_v35, %v1094_v12  ;;  %3604 = vmatprep.subr.bf16.mxu1 %v4127_v47 }
 0x2a0   : > { %3358 = vmatprep.subr.bf16.mxu0 %v1112_v30  ;;  %3598 = vmatprep.mubr.bf16.mxu1 %v1112_v30 }
 0x2a1   : > { %3359 = vmatpush3.bf16.msra.mxu0 %v5045_v16  ;;  %3599 = vmatmul.mubr.bf16.gmra.mrb[92].mxu1 %v1113_v51  ;;  %v4120_v16 = vld [vmem:[#allocation5 + $0x90] sm:$0xff]  }
 0x2a2   : > { %3360 = vmatprep.subr.bf16.mxu0 %v1113_v51  ;;  %3618 = vmatprep.mubr.bf16.mxu1 %v4634_v8  ;;  %v4178_v8 = vld [vmem:[%s4662_s22 + $0x24] ss:$8 sps:$4 sm:$0xff]  }
 0x2a3   : > { %3605 = vmatpush3.bf16.msra.mxu1 %v4127_v47  ;;  %v5384_v47 = vld [vmem:[#allocation18_spill] sm:$0xff] }
 0x2a4   : > { %3606 = vmatprep.subr.bf16.mxu1 %v4128_v26 }
 0x2a5   : > { %3361 = vmatpush3.bf16.msra.mxu0 %v5043_v44  ;;  %v4122_v44 = vld [vmem:[#allocation5 + $0xa0] sm:$0xff]  }
 0x2a6   : > { %3698 = vmatprep.subr.bf16.mxu0 %v4118_v4 }
 0x2a7   : > { %3607 = vmatpush3.bf16.msra.mxu1 %v4128_v26 }
 0x2a8   : > { %2020 = vmatmul.mubr.bf16.vlgmr.msra.gmra.mrb[64].mxu0 %v4175_v3  ;;  %v4132_v3 = vld [vmem:[#allocation7 + $0x30] sm:$0xff]  }
 0x2a9   : > { %2027 = vmatprep.mubr.bf16.mxu0 %v4176_v58  ;;  %3699 = vmatpush3.bf16.msra.mxu0 %v4118_v4 }
 0x2aa   : > { %3700 = vmatprep.subr.bf16.mxu0 %v4119_v11 }
 0x2ad   : > { %3701 = vmatpush3.bf16.msra.mxu0 %v4119_v11 }
 0x2ae   : > { %3702 = vmatprep.subr.bf16.mxu0 %v4120_v16 }
 0x2b0   : > { %2028 = vmatmul.mubr.bf16.gmra.mrb[68].mxu0 %v4177_v60 }
 0x2b1   : > { %2035 = vmatprep.mubr.bf16.mxu0 %v4178_v8  ;;  %3703 = vmatpush3.bf16.msra.mxu0 %v4120_v16 }
 0x2b2   : > { %3704 = vmatprep.subr.bf16.mxu0 %v4121_v57 }
 0x2b5   : > { %3705 = vmatpush3.bf16.msra.mxu0 %v4121_v57  ;;  %v4133_v57 = vld [vmem:[#allocation7 + $0x38] sm:$0xff]  }
 0x2b6   : > { %3706 = vmatprep.subr.bf16.mxu0 %v4122_v44 }
 0x2b8   : > { %2036 = vmatmul.mubr.bf16.gmra.mrb[72].mxu0 %v4179_v22 }
 0x2b9   : > { %2043 = vmatprep.mubr.bf16.mxu0 %v4180_v38  ;;  %3707 = vmatpush3.bf16.msra.mxu0 %v4122_v44 }
 0x2c0   : > { %2044 = vmatmul.mubr.bf16.gmra.mrb[76].mxu0 %v4181_v25  ;;  %v4134_v25 = vld [vmem:[#allocation7 + $0x80] sm:$0xff]  }
 0x2c1   : > { %2051 = vmatprep.mubr.bf16.mxu0 %v4182_v39 }
 0x2c8   : > { %2052 = vmatmul.mubr.bf16.gmra.mrb[80].mxu0 %v4183_v43 }
 0x2c9   : > { %2059 = vmatprep.mubr.bf16.mxu0 %v4184_v53  ;;  %v4135_v53 = vld [vmem:[#allocation7 + $0x88] sm:$0xff]  }
 0x2d0   : > { %2060 = vmatmul.mubr.bf16.gmra.mrb[84].mxu0 %v4185_v21 }
 0x2d1   : > { %2067 = vmatprep.mubr.bf16.mxu0 %v4780_v55  ;;  %v4191_v55 = vld [vmem:[%s4662_s22 + $0xa0] ss:$8 sps:$4 sm:$0xff]  }
 0x2d8   : > { %2068 = vmatmul.mubr.bf16.gmra.mrb[88].mxu0 %v4789_v61  ;;  %v4192_v61 = vld [vmem:[%s4662_s22 + $0xb4] ss:$8 sps:$4 sm:$0xff]  }
 0x2d9   : > { %2075 = vmatprep.mubr.bf16.mxu0 %v4795_v63  ;;  %v4123_v63 = vld [vmem:[#allocation5 + $0xa8] sm:$0xff]  }
 0x2da   : > { %3708 = vmatprep.subr.bf16.mxu0 %v4123_v63 }
 0x2db   : > { %3709 = vmatpush3.bf16.msra.mxu0 %v4123_v63  ;;  %v4137_v63 = vld [vmem:[#allocation7 + $0x98] sm:$0xff]  }
 0x2dc   : > { %3710 = vmatprep.subr.bf16.mxu0 %v4124_v31 }
 0x2df   : > { %3711 = vmatpush3.bf16.msra.mxu0 %v4124_v31 }
 0x2e0   : > { %2076 = vmatmul.mubr.bf16.gmra.mrb[92].mxu0 %v4809_v6  ;;  %v4193_v6 = vld [vmem:[%s4662_s22 + $0xb0] ss:$8 sps:$4 sm:$0xff]   ;;  %3712 = vmatprep.subr.bf16.mxu0 %v4125_v28  ;;  %s4319_s22 = scalar_lea.vmem %s4318_s11, 8192 }
 0x2e1   : > { %2083 = vmatprep.mubr.bf16.mxu0 %v4186_v37  ;;  %p4321_p2 = scmp.lt.s32.totalorder %s4319_s22, %s4313_s9 }
 0x2e3   : > { %3713 = vmatpush3.bf16.msra.mxu0 %v4125_v28  ;;  %p4322_p13 = por %p4321_p2, %p4320_p12 }
 0x2e5   : > { %p4323_p6 = pnand %p4322_p13, %p4316_p9 }
 0x2e8   : > { %2084 = vmatmul.mubr.bf16.gmra.mrb[96].mxu0 %v4187_v33 }
 0x2e9   : > { %2091 = vmatprep.mubr.bf16.mxu0 %v4188_v42 }
 0x2f0   : > { %2092 = vmatmul.mubr.bf16.gmra.mrb[100].mxu0 %v4189_v41 }
 0x2f1   : > { %2099 = vmatprep.mubr.bf16.mxu0 %v4190_v18  ;;  %v4136_v18 = vld [vmem:[#allocation7 + $0x90] sm:$0xff]  }
 0x2f8   : > { %2100 = vmatmul.mubr.bf16.gmra.mrb[104].mxu0 %v4191_v55 }
 0x2f9   : > { %2107 = vmatprep.mubr.bf16.mxu0 %v4192_v61 }
 0x300   : > { %2108 = vmatmul.mubr.bf16.gmra.mrb[108].mxu0 %v4193_v6 }
 0x301   : > { %2115 = vmatprep.mubr.bf16.mxu0 %v4194_v15 }
 0x308   : > { %2116 = vmatmul.mubr.bf16.gmra.mrb[112].mxu0 %v4195_v24 }
 0x309   : > { %2123 = vmatprep.mubr.bf16.mxu0 %v4196_v50 }
 0x310   : > { %2124 = vmatmul.mubr.bf16.gmra.mrb[116].mxu0 %v4197_v46  ;;  %v4139_v46 = vld [vmem:[#allocation7 + $0xa8] sm:$0xff]  }
 0x311   : > { %2131 = vmatprep.mubr.bf16.mxu0 %v4198_v32 }
 0x318   : > { %2132 = vmatmul.mubr.bf16.gmra.mrb[120].mxu0 %v4792_v62  ;;  %v4129_v62 = vld [vmem:[#allocation7 + $0x18] sm:$0xff]  }
 0x319   : > { %2139 = vmatprep.mubr.bf16.mxu0 %v4798_v0  ;;  %3608 = vmatprep.subr.bf16.mxu1 %v4129_v62 }
 0x31a   : > { %3609 = vmatpush3.bf16.msra.mxu1 %v4129_v62  ;;  %v5387_v62 = vld [vmem:[#allocation12_spill] sm:$0xff] }
 0x31b   : > { %3610 = vmatprep.subr.bf16.mxu1 %v4130_v29 }
 0x31e   : > { %3611 = vmatpush3.bf16.msra.mxu1 %v4130_v29 }
 0x31f   : > { %3612 = vmatprep.subr.bf16.mxu1 %v4131_v52 }
 0x320   : > { %2140 = vmatmul.mubr.bf16.gmra.mrb[124].mxu0 %v4812_v7 }
 0x322   : > { %3613 = vmatpush3.bf16.msra.mxu1 %v4131_v52  ;;  %v5389_v52 = vld [vmem:[#allocation14_spill] sm:$0xff] }
 0x323   : > { %3614 = vmatprep.subr.bf16.mxu1 %v4132_v3 }
 0x326   : > { %3615 = vmatpush3.bf16.msra.mxu1 %v4132_v3 }
 0x327   : > { %3616 = vmatprep.subr.bf16.mxu1 %v4133_v57 }
 0x32a   : > { %3617 = vmatpush3.bf16.msra.mxu1 %v4133_v57  ;;  %v5391_v57 = vld [vmem:[#allocation16_spill] sm:$0xff] }
 0x32b   : > { %3746 = vmatprep.subr.bf16.mxu1 %v4134_v25 }
 0x32d   : > { %3619 = vmatmul.mubr.bf16.vlgmr.msra.gmra.mrb[64].mxu1 %v4645_v14 }
 0x32e   : > { %3622 = vmatprep.mubr.bf16.mxu1 %v4657_v20  ;;  %3747 = vmatpush3.bf16.msra.mxu1 %v4134_v25  ;;  %v4138_v20 = vld [vmem:[#allocation7 + $0xa0] sm:$0xff]  }
 0x32f   : > { %3748 = vmatprep.subr.bf16.mxu1 %v4135_v53 }
 0x332   : > { %3749 = vmatpush3.bf16.msra.mxu1 %v4135_v53  ;;  %v5393_v53 = vld [vmem:[#allocation19_spill] sm:$0xff] }
 0x333   : > { %3750 = vmatprep.subr.bf16.mxu1 %v4136_v18 }
 0x335   : > { %3623 = vmatmul.mubr.bf16.gmra.mrb[68].mxu1 %v4675_v27  ;;  %v5385_v27 = vld [vmem:[#allocation20_spill] sm:$0xff] }
 0x336   : > { %3626 = vmatprep.mubr.bf16.mxu1 %v4689_v34  ;;  %3751 = vmatpush3.bf16.msra.mxu1 %v4136_v18 }
 0x337   : > { %3752 = vmatprep.subr.bf16.mxu1 %v4137_v63 }
 0x33a   : > { %3753 = vmatpush3.bf16.msra.mxu1 %v4137_v63 }
 0x33b   : > { %3754 = vmatprep.subr.bf16.mxu1 %v4138_v20 }
 0x33d   : > { %3627 = vmatmul.mubr.bf16.gmra.mrb[72].mxu1 %v5384_v47 }
 0x33e   : > { %3630 = vmatprep.mubr.bf16.mxu1 %v5385_v27  ;;  %3755 = vmatpush3.bf16.msra.mxu1 %v4138_v20  ;;  %v4140_v20 = vld [vmem:[#allocation7 + $0xb0] sm:$0xff]  }
 0x33f   : > { %3756 = vmatprep.subr.bf16.mxu1 %v4139_v46 }
 0x342   : > { %3757 = vmatpush3.bf16.msra.mxu1 %v4139_v46 }
 0x343   : > { %3758 = vmatprep.subr.bf16.mxu1 %v4140_v20 }
 0x346   : > { %3759 = vmatpush3.bf16.msra.mxu1 %v4140_v20 }
 0x37b   : > { %v3362_v40 = vpop.f32.mrb[64].mxu0 }
 0x37c   : > { %v3363_v59 = vpop.f32.mrb[65].mxu0 }
 0x37d   : > { %v3364_v9 = vadd.f32 %v3363_v59, %v3362_v40  ;;  %v3365_v5 = vpop.f32.mrb[66].mxu0 }
 0x37e   : > { %v3366_v10 = vpop.f32.mrb[67].mxu0 }
 0x37f   : > { %v3367_v17 = vadd.f32 %v3366_v10, %v3365_v5 }
 0x381   : > { %v2148_v1 = vpack.c.bf16 %v3367_v17, %v3364_v9 }
 0x383   : > { %v3368_v48 = vpop.f32.mrb[68].mxu0  ;;  %3714 = vmatprep.mubr.bf16.mxu0 %v2148_v1  ;;  %v5386_v1 = vld [vmem:[#allocation22_spill] sm:$0xff] }
 0x384   : > { %v3369_v0 = vpop.f32.mrb[69].mxu0  ;;  %3631 = vmatmul.mubr.bf16.gmra.mrb[76].mxu1 %v5386_v1 }
 0x385   : > { %v3370_v7 = vadd.f32 %v3369_v0, %v3368_v48  ;;  %v3371_v2 = vpop.f32.mrb[70].mxu0  ;;  %3634 = vmatprep.mubr.bf16.mxu1 %v5387_v62 }
 0x386   : > { %v3372_v23 = vpop.f32.mrb[71].mxu0 }
 0x387   : > { %v3373_v56 = vadd.f32 %v3372_v23, %v3371_v2 }
 0x389   : > { %v2149_v19 = vpack.c.bf16 %v3373_v56, %v3370_v7 }
 0x38b   : > { %3715 = vmatmul.mubr.bf16.vlgmr.msra.gmra.mrb[32].mxu0 %v2149_v19  ;;  %v3374_v12 = vpop.f32.mrb[72].mxu0  ;;  %v5388_v19 = vld [vmem:[#allocation13_spill] sm:$0xff] }
 0x38c   : > { %v3375_v35 = vpop.f32.mrb[73].mxu0  ;;  %3635 = vmatmul.mubr.bf16.gmra.mrb[80].mxu1 %v5388_v19 }
 0x38d   : > { %v3376_v51 = vadd.f32 %v3375_v35, %v3374_v12  ;;  %v3377_v30 = vpop.f32.mrb[74].mxu0  ;;  %3638 = vmatprep.mubr.bf16.mxu1 %v5389_v52  ;;  %v3112_v52 = vld [vmem:[%s5334_s4 + $0x2] ss:$0 sm:$0xff] }
 0x38e   : > { %v3378_v4 = vpop.f32.mrb[75].mxu0 }
 0x38f   : > { %v3379_v11 = vadd.f32 %v3378_v4, %v3377_v30 }
 0x391   : > { %v2150_v58 = vpack.c.bf16 %v3379_v11, %v3376_v51 }
 0x393   : > { %v3380_v16 = vpop.f32.mrb[76].mxu0  ;;  %3718 = vmatprep.mubr.bf16.mxu0 %v2150_v58  ;;  %v5390_v58 = vld [vmem:[#allocation15_spill] sm:$0xff] }
 0x394   : > { %v3381_v60 = vpop.f32.mrb[77].mxu0  ;;  %3639 = vmatmul.mubr.bf16.gmra.mrb[84].mxu1 %v5390_v58 }
 0x395   : > { %v3382_v8 = vadd.f32 %v3381_v60, %v3380_v16  ;;  %v3383_v44 = vpop.f32.mrb[78].mxu0  ;;  %3642 = vmatprep.mubr.bf16.mxu1 %v5391_v57 }
 0x396   : > { %v3384_v22 = vpop.f32.mrb[79].mxu0 }
 0x397   : > { %v3385_v38 = vadd.f32 %v3384_v22, %v3383_v44 }
 0x399   : > { %v2151_v39 = vpack.c.bf16 %v3385_v38, %v3382_v8 }
 0x39b   : > { %3719 = vmatmul.mubr.bf16.gmra.mrb[36].mxu0 %v2151_v39  ;;  %v3386_v43 = vpop.f32.mrb[80].mxu0  ;;  %v5392_v39 = vld [vmem:[#allocation17_spill] sm:$0xff] }
 0x39c   : > { %v3387_v21 = vpop.f32.mrb[81].mxu0  ;;  %3643 = vmatmul.mubr.bf16.gmra.mrb[88].mxu1 %v5392_v39 }
 0x39d   : > { %v3388_v37 = vadd.f32 %v3387_v21, %v3386_v43  ;;  %v3389_v33 = vpop.f32.mrb[82].mxu0  ;;  %3646 = vmatprep.mubr.bf16.mxu1 %v5393_v53 }
 0x39e   : > { %v3390_v42 = vpop.f32.mrb[83].mxu0 }
 0x39f   : > { %v3391_v41 = vadd.f32 %v3390_v42, %v3389_v33 }
 0x3a1   : > { %v2152_v55 = vpack.c.bf16 %v3391_v41, %v3388_v37 }
 0x3a3   : > { %v3392_v61 = vpop.f32.mrb[84].mxu0  ;;  %3722 = vmatprep.mubr.bf16.mxu0 %v2152_v55  ;;  %v5394_v55 = vld [vmem:[#allocation21_spill] sm:$0xff] }
 0x3a4   : > { %v3393_v6 = vpop.f32.mrb[85].mxu0  ;;  %3647 = vmatmul.mubr.bf16.gmra.mrb[92].mxu1 %v5394_v55 }
 0x3a5   : > { %v3394_v15 = vadd.f32 %v3393_v6, %v3392_v61  ;;  %v3395_v31 = vpop.f32.mrb[86].mxu0 }
 0x3a6   : > { %v3396_v28 = vpop.f32.mrb[87].mxu0 }
 0x3a7   : > { %v3397_v14 = vadd.f32 %v3396_v28, %v3395_v31 }
 0x3a9   : > { %v2153_v24 = vpack.c.bf16 %v3397_v14, %v3394_v15 }
 0x3ab   : > { %3723 = vmatmul.mubr.bf16.gmra.mrb[40].mxu0 %v2153_v24  ;;  %v3398_v50 = vpop.f32.mrb[88].mxu0 }
 0x3ac   : > { %v3399_v32 = vpop.f32.mrb[89].mxu0 }
 0x3ad   : > { %v3400_v40 = vadd.f32 %v3399_v32, %v3398_v50  ;;  %v3401_v45 = vpop.f32.mrb[90].mxu0  ;;  %v4141_v32 = vld [vmem:[#allocation7 + $0xb8] sm:$0xff]  }
 0x3ae   : > { %v3402_v59 = vpop.f32.mrb[91].mxu0  ;;  %3760 = vmatprep.subr.bf16.mxu1 %v4141_v32 }
 0x3af   : > { %v3403_v34 = vadd.f32 %v3402_v59, %v3401_v45  ;;  %3761 = vmatpush3.bf16.msra.mxu1 %v4141_v32 }
 0x3b1   : > { %v2154_v9 = vpack.c.bf16 %v3403_v34, %v3400_v40 }
 0x3b3   : > { %v3404_v5 = vpop.f32.mrb[92].mxu0  ;;  %3726 = vmatprep.mubr.bf16.mxu0 %v2154_v9 }
 0x3b4   : > { %v3405_v10 = vpop.f32.mrb[93].mxu0 }
 0x3b5   : > { %v3406_v17 = vadd.f32 %v3405_v10, %v3404_v5  ;;  %v3407_v26 = vpop.f32.mrb[94].mxu0 }
 0x3b6   : > { %v3408_v48 = vpop.f32.mrb[95].mxu0 }
 0x3b7   : > { %v3409_v0 = vadd.f32 %v3408_v48, %v3407_v26 }
 0x3b9   : > { %v2155_v7 = vpack.c.bf16 %v3409_v0, %v3406_v17 }
 0x3bb   : > { %3727 = vmatmul.mubr.bf16.gmra.mrb[44].mxu0 %v2155_v7  ;;  %v3410_v2 = vpop.f32.mrb[96].mxu0 }
 0x3bc   : > { %v3411_v23 = vpop.f32.mrb[97].mxu0 }
 0x3bd   : > { %v3412_v56 = vadd.f32 %v3411_v23, %v3410_v2  ;;  %v3413_v29 = vpop.f32.mrb[98].mxu0 }
 0x3be   : > { %v3414_v12 = vpop.f32.mrb[99].mxu0 }
 0x3bf   : > { %v3415_v35 = vadd.f32 %v3414_v12, %v3413_v29  ;;  %v3103_v12 = vld [vmem:[%s5334_s4 + $0x1] ss:$0 sm:$0xff] }
 0x3c1   : > { %v2156_v51 = vpack.c.bf16 %v3415_v35, %v3412_v56  ;;  %v5142_v35 = vadd.f32 %v3112_v52, %v3103_v12 }
 0x3c3   : > { %v3416_v30 = vpop.f32.mrb[100].mxu0  ;;  %3730 = vmatprep.mubr.bf16.mxu0 %v2156_v51 }
 0x3c4   : > { %v3417_v4 = vpop.f32.mrb[101].mxu0 }
 0x3c5   : > { %v3418_v11 = vadd.f32 %v3417_v4, %v3416_v30  ;;  %v3419_v3 = vpop.f32.mrb[102].mxu0 }
 0x3c6   : > { %v3420_v16 = vpop.f32.mrb[103].mxu0 }
 0x3c7   : > { %v3421_v60 = vadd.f32 %v3420_v16, %v3419_v3 }
 0x3c9   : > { %v2157_v8 = vpack.c.bf16 %v3421_v60, %v3418_v11 }
 0x3cb   : > { %3731 = vmatmul.mubr.bf16.gmra.mrb[48].mxu0 %v2157_v8  ;;  %v3422_v44 = vpop.f32.mrb[104].mxu0 }
 0x3cc   : > { %v3423_v22 = vpop.f32.mrb[105].mxu0 }
 0x3cd   : > { %v3424_v38 = vadd.f32 %v3423_v22, %v3422_v44  ;;  %v3425_v25 = vpop.f32.mrb[106].mxu0 }
 0x3ce   : > { %v3426_v43 = vpop.f32.mrb[107].mxu0 }
 0x3cf   : > { %v3427_v21 = vadd.f32 %v3426_v43, %v3425_v25 }
 0x3d1   : > { %v2158_v37 = vpack.c.bf16 %v3427_v21, %v3424_v38 }
 0x3d3   : > { %v3428_v33 = vpop.f32.mrb[108].mxu0  ;;  %3734 = vmatprep.mubr.bf16.mxu0 %v2158_v37 }
 0x3d4   : > { %v3429_v42 = vpop.f32.mrb[109].mxu0 }
 0x3d5   : > { %v3430_v41 = vadd.f32 %v3429_v42, %v3428_v33  ;;  %v3431_v18 = vpop.f32.mrb[110].mxu0 }
 0x3d6   : > { %v3432_v61 = vpop.f32.mrb[111].mxu0 }
 0x3d7   : > { %v3433_v63 = vadd.f32 %v3432_v61, %v3431_v18 }
 0x3d9   : > { %v2159_v6 = vpack.c.bf16 %v3433_v63, %v3430_v41 }
 0x3db   : > { %3735 = vmatmul.mubr.bf16.gmra.mrb[52].mxu0 %v2159_v6  ;;  %v3434_v15 = vpop.f32.mrb[112].mxu0 }
 0x3dc   : > { %v3435_v31 = vpop.f32.mrb[113].mxu0 }
 0x3dd   : > { %v3436_v28 = vadd.f32 %v3435_v31, %v3434_v15  ;;  %v3437_v14 = vpop.f32.mrb[114].mxu0 }
 0x3de   : > { %v3438_v24 = vpop.f32.mrb[115].mxu0 }
 0x3df   : > { %v3439_v50 = vadd.f32 %v3438_v24, %v3437_v14 }
 0x3e1   : > { %v2160_v46 = vpack.c.bf16 %v3439_v50, %v3436_v28 }
 0x3e3   : > { %v3440_v40 = vpop.f32.mrb[116].mxu0  ;;  %3738 = vmatprep.mubr.bf16.mxu0 %v2160_v46 }
 0x3e4   : > { %v3441_v45 = vpop.f32.mrb[117].mxu0 }
 0x3e5   : > { %v3442_v47 = vadd.f32 %v3441_v45, %v3440_v40  ;;  %v3443_v59 = vpop.f32.mrb[118].mxu0 }
 0x3e6   : > { %v3444_v27 = vpop.f32.mrb[119].mxu0 }
 0x3e7   : > { %v3445_v34 = vadd.f32 %v3444_v27, %v3443_v59 }
 0x3e9   : > { %v2161_v9 = vpack.c.bf16 %v3445_v34, %v3442_v47 }
 0x3eb   : > { %3739 = vmatmul.mubr.bf16.gmra.mrb[56].mxu0 %v2161_v9  ;;  %v3446_v5 = vpop.f32.mrb[120].mxu0 }
 0x3ec   : > { %v3447_v10 = vpop.f32.mrb[121].mxu0 }
 0x3ed   : > { %v3448_v17 = vadd.f32 %v3447_v10, %v3446_v5  ;;  %v3449_v26 = vpop.f32.mrb[122].mxu0 }
 0x3ee   : > { %v3450_v1 = vpop.f32.mrb[123].mxu0 }
 0x3ef   : > { %v3451_v48 = vadd.f32 %v3450_v1, %v3449_v26 }
 0x3f1   : > { %v2162_v62 = vpack.c.bf16 %v3451_v48, %v3448_v17 }
 0x3f3   : > { %v3452_v0 = vpop.f32.mrb[124].mxu0  ;;  %3742 = vmatprep.mubr.bf16.mxu0 %v2162_v62 }
 0x3f4   : > { %v3453_v7 = vpop.f32.mrb[125].mxu0 }
 0x3f5   : > { %v3454_v2 = vadd.f32 %v3453_v7, %v3452_v0  ;;  %v3455_v23 = vpop.f32.mrb[126].mxu0 }
 0x3f6   : > { %v3456_v56 = vpop.f32.mrb[127].mxu0 }
 0x3f7   : > { %v3457_v29 = vadd.f32 %v3456_v56, %v3455_v23 }
 0x3f9   : > { %v2163_v19 = vpack.c.bf16 %v3457_v29, %v3454_v2 }
 0x3fb   : > { %3743 = vmatmul.mubr.bf16.gmra.mrb[60].mxu0 %v2163_v19 }
 0x45e   : > { %v3716_v51 = vpop.f32.mrb[32].mxu0 }
 0x45f   : > { %v3810_v30 = vadd.f32 %v3716_v51, %v3103_v12  ;;  %v2268_v4 = vpop.f32.mrb[33].mxu0 }
 0x460   : > { %v3812_v11 = vadd.f32 %v3103_v12, %v2268_v4  ;;  %v3717_v3 = vpop.f32.mrb[34].mxu0 }
 0x461   : > { %v3811_v58 = vadd.f32 %v3810_v30, %v3112_v52  ;;  %v3815_v16 = vadd.f32 %v5142_v35, %v3717_v3  ;;  %v2271_v57 = vpop.f32.mrb[35].mxu0 }
 0x462   : > { %v3813_v60 = vadd.f32 %v3812_v11, %v3112_v52  ;;  %v3817_v8 = vadd.f32 %v5142_v35, %v2271_v57 }
 0x463   : > { %v2428_v44 = vpack.c.bf16 %v3815_v16, %v3811_v58 }
 0x464   : > { %v2427_v22 = vpack.c.bf16 %v3817_v8, %v3813_v60 }
 0x466   : > { %3762 = vmatprep.mubr.bf16.mxu1 %v2427_v22 }
 0x467   : > { %3763 = vmatmul.mubr.bf16.vlgmr.msra.gmra.mrb[64].mxu1 %v2428_v44 }
 0x46e   : > { %v3720_v38 = vpop.f32.mrb[36].mxu0 }
 0x46f   : > { %v2284_v25 = vpop.f32.mrb[37].mxu0  ;;  %v3819_v43 = vadd.f32 %v5142_v35, %v3720_v38 }
 0x470   : > { %v3721_v39 = vpop.f32.mrb[38].mxu0  ;;  %v3821_v37 = vadd.f32 %v5142_v35, %v2284_v25 }
 0x471   : > { %v3823_v53 = vadd.f32 %v5142_v35, %v3721_v39  ;;  %v2287_v21 = vpop.f32.mrb[39].mxu0 }
 0x472   : > { %v3825_v33 = vadd.f32 %v5142_v35, %v2287_v21 }
 0x473   : > { %v2430_v42 = vpack.c.bf16 %v3823_v53, %v3819_v43 }
 0x474   : > { %v2429_v41 = vpack.c.bf16 %v3825_v33, %v3821_v37 }
 0x476   : > { %3766 = vmatprep.mubr.bf16.mxu1 %v2429_v41 }
 0x477   : > { %3767 = vmatmul.mubr.bf16.gmra.mrb[68].mxu1 %v2430_v42 }
 0x47e   : > { %v3724_v18 = vpop.f32.mrb[40].mxu0 }
 0x47f   : > { %v2300_v55 = vpop.f32.mrb[41].mxu0  ;;  %v3827_v63 = vadd.f32 %v5142_v35, %v3724_v18 }
 0x480   : > { %v3725_v61 = vpop.f32.mrb[42].mxu0  ;;  %v3829_v31 = vadd.f32 %v5142_v35, %v2300_v55  ;;  %v5177_v55 = vld [vmem:[%s5336_s6] ss:$0 sm:$0xff] }
 0x481   : > { %v3831_v6 = vadd.f32 %v5142_v35, %v3725_v61  ;;  %v2303_v15 = vpop.f32.mrb[43].mxu0 }
 0x482   : > { %v3833_v28 = vadd.f32 %v5142_v35, %v2303_v15 }
 0x483   : > { %v2432_v14 = vpack.c.bf16 %v3831_v6, %v3827_v63 }
 0x484   : > { %v2431_v20 = vpack.c.bf16 %v3833_v28, %v3829_v31 }
 0x486   : > { %3770 = vmatprep.mubr.bf16.mxu1 %v2431_v20 }
 0x487   : > { %3771 = vmatmul.mubr.bf16.gmra.mrb[72].mxu1 %v2432_v14 }
 0x48e   : > { %v3728_v24 = vpop.f32.mrb[44].mxu0 }
 0x48f   : > { %v2316_v50 = vpop.f32.mrb[45].mxu0  ;;  %v3835_v32 = vadd.f32 %v5142_v35, %v3728_v24 }
 0x490   : > { %v3729_v46 = vpop.f32.mrb[46].mxu0  ;;  %v3837_v47 = vadd.f32 %v5142_v35, %v2316_v50 }
 0x491   : > { %v3839_v40 = vadd.f32 %v5142_v35, %v3729_v46  ;;  %v2319_v45 = vpop.f32.mrb[47].mxu0 }
 0x492   : > { %v3841_v59 = vadd.f32 %v5142_v35, %v2319_v45 }
 0x493   : > { %v2434_v27 = vpack.c.bf16 %v3839_v40, %v3835_v32 }
 0x494   : > { %v2433_v34 = vpack.c.bf16 %v3841_v59, %v3837_v47 }
 0x496   : > { %3774 = vmatprep.mubr.bf16.mxu1 %v2433_v34 }
 0x497   : > { %3775 = vmatmul.mubr.bf16.gmra.mrb[76].mxu1 %v2434_v27 }
 0x49e   : > { %v3732_v9 = vpop.f32.mrb[48].mxu0 }
 0x49f   : > { %v2332_v5 = vpop.f32.mrb[49].mxu0  ;;  %v3843_v17 = vadd.f32 %v5142_v35, %v3732_v9 }
 0x4a0   : > { %v3733_v10 = vpop.f32.mrb[50].mxu0  ;;  %v3845_v48 = vadd.f32 %v5142_v35, %v2332_v5 }
 0x4a1   : > { %v3847_v26 = vadd.f32 %v5142_v35, %v3733_v10  ;;  %v2335_v1 = vpop.f32.mrb[51].mxu0 }
 0x4a2   : > { %v3849_v62 = vadd.f32 %v5142_v35, %v2335_v1 }
 0x4a3   : > { %v2436_v0 = vpack.c.bf16 %v3847_v26, %v3843_v17 }
 0x4a4   : > { %v2435_v7 = vpack.c.bf16 %v3849_v62, %v3845_v48 }
 0x4a6   : > { %3778 = vmatprep.mubr.bf16.mxu1 %v2435_v7  ;;  %v4199_v7 = vld [vmem:[%s4614_s21 + $0x30] sm:$0xff] }
 0x4a7   : > { %3779 = vmatmul.mubr.bf16.gmra.mrb[80].mxu1 %v2436_v0 }
 0x4ae   : > { %v3736_v2 = vpop.f32.mrb[52].mxu0 }
 0x4af   : > { %v2348_v23 = vpop.f32.mrb[53].mxu0  ;;  %v3851_v29 = vadd.f32 %v5142_v35, %v3736_v2 }
 0x4b0   : > { %v3737_v56 = vpop.f32.mrb[54].mxu0  ;;  %v3853_v52 = vadd.f32 %v5142_v35, %v2348_v23 }
 0x4b1   : > { %v3855_v19 = vadd.f32 %v5142_v35, %v3737_v56  ;;  %v2351_v12 = vpop.f32.mrb[55].mxu0 }
 0x4b2   : > { %v3857_v51 = vadd.f32 %v5142_v35, %v2351_v12 }
 0x4b3   : > { %v2438_v30 = vpack.c.bf16 %v3855_v19, %v3851_v29  ;;  %v4200_v29 = vld [vmem:[%s4614_s21 + $0x20] sm:$0xff] }
 0x4b4   : > { %v2437_v4 = vpack.c.bf16 %v3857_v51, %v3853_v52  ;;  %v4201_v52 = vld [vmem:[%s4614_s21 + $0x38] sm:$0xff] }
 0x4b6   : > { %3782 = vmatprep.mubr.bf16.mxu1 %v2437_v4  ;;  %v4202_v4 = vld [vmem:[%s4614_s21 + $0x28] sm:$0xff] }
 0x4b7   : > { %3783 = vmatmul.mubr.bf16.gmra.mrb[84].mxu1 %v2438_v30 }
 0x4be   : > { %v3740_v11 = vpop.f32.mrb[56].mxu0 }
 0x4bf   : > { %v2364_v3 = vpop.f32.mrb[57].mxu0  ;;  %v3859_v16 = vadd.f32 %v5142_v35, %v3740_v11 }
 0x4c0   : > { %v3741_v58 = vpop.f32.mrb[58].mxu0  ;;  %v3861_v8 = vadd.f32 %v5142_v35, %v2364_v3 }
 0x4c1   : > { %v3863_v57 = vadd.f32 %v5142_v35, %v3741_v58  ;;  %v2367_v60 = vpop.f32.mrb[59].mxu0 }
 0x4c2   : > { %v3865_v44 = vadd.f32 %v5142_v35, %v2367_v60 }
 0x4c3   : > { %v2440_v22 = vpack.c.bf16 %v3863_v57, %v3859_v16 }
 0x4c4   : > { %v2439_v38 = vpack.c.bf16 %v3865_v44, %v3861_v8 }
 0x4c6   : > { %3786 = vmatprep.mubr.bf16.mxu1 %v2439_v38 }
 0x4c7   : > { %3787 = vmatmul.mubr.bf16.gmra.mrb[88].mxu1 %v2440_v22 }
 0x4ce   : > { %v3744_v25 = vpop.f32.mrb[60].mxu0 }
 0x4cf   : > { %v2380_v39 = vpop.f32.mrb[61].mxu0  ;;  %v3867_v53 = vadd.f32 %v5142_v35, %v3744_v25 }
 0x4d0   : > { %v3745_v43 = vpop.f32.mrb[62].mxu0  ;;  %v3869_v33 = vadd.f32 %v5142_v35, %v2380_v39 }
 0x4d1   : > { %v3871_v21 = vadd.f32 %v5142_v35, %v3745_v43  ;;  %v2383_v37 = vpop.f32.mrb[63].mxu0 }
 0x4d2   : > { %v3873_v42 = vadd.f32 %v5142_v35, %v2383_v37 }
 0x4d3   : > { %v2442_v41 = vpack.c.bf16 %v3871_v21, %v3867_v53  ;;  %v4203_v53 = vld [vmem:[%s4614_s21 + $0x50] sm:$0xff] }
 0x4d4   : > { %v2441_v18 = vpack.c.bf16 %v3873_v42, %v3869_v33  ;;  %v4204_v42 = vld [vmem:[%s4614_s21 + $0x40] sm:$0xff] }
 0x4d6   : > { %3790 = vmatprep.mubr.bf16.mxu1 %v2441_v18 }
 0x4d7   : > { %3791 = vmatmul.mubr.bf16.gmra.mrb[92].mxu1 %v2442_v41 }
 0x53a   : > { %v3764_v61 = vpop.f32.mrb[64].mxu1 }
 0x53b   : > { %v2709_v63 = vadd.f32 %v3764_v61, %v5177_v55  ;;  %v2541_v6 = vpop.f32.mrb[65].mxu1  ;;  %v4205_v61 = vld [vmem:[%s4614_s21 + $0x58] sm:$0xff] }
 0x53c   : > { %v2707_v15 = vadd.f32 %v5177_v55, %v2541_v6  ;;  %v3765_v31 = vpop.f32.mrb[66].mxu1 }
 0x53d   : > { %vm2741_vm0 = vcmp.ge.f32.partialorder %v2709_v63, 0.0  ;;  %v2773_v28 = vmul.f32 0.2, %v2709_v63  ;;  %v2710_v35 = vadd.f32 %v3765_v31, %v5177_v55  ;;  %v2544_v14 = vpop.f32.mrb[67].mxu1 }
 0x53e   : > { %vm2739_vm1 = vcmp.ge.f32.partialorder %v2707_v15, 0.0  ;;  %v2771_v20 = vmul.f32 0.2, %v2707_v15  ;;  %v2708_v24 = vadd.f32 %v5177_v55, %v2544_v14 }
 0x53f   : > { %v2805_v50 = vsel %vm2741_vm0, %v2709_v63, %v2773_v28  ;;  %vm2742_vm2 = vcmp.ge.f32.partialorder %v2710_v35, 0.0  ;;  %v2774_v46 = vmul.f32 0.2, %v2710_v35 }
 0x540   : > { %v2837_v32 = vadd.f32 %v4986_v13, %v2805_v50  ;;  %v2803_v40 = vsel %vm2739_vm1, %v2707_v15, %v2771_v20  ;;  %vm2740_vm3 = vcmp.ge.f32.partialorder %v2708_v24, 0.0  ;;  %v2772_v45 = vmul.f32 0.2, %v2708_v24  ;;  %v4206_v15 = vld [vmem:[%s4614_s21 + $0x48] sm:$0xff] }
 0x541   : > { %v2835_v47 = vadd.f32 %v4994_v36, %v2803_v40  ;;  %v2806_v59 = vsel %vm2742_vm2, %v2710_v35, %v2774_v46 }
 0x542   : > { %2869 = vst [vmem:[%s5187_s19 + $0x10] sm:$0xff] %v2837_v32  ;;  %v2838_v27 = vadd.f32 %v4990_v49, %v2806_v59  ;;  %v2804_v34 = vsel %vm2740_vm3, %v2708_v24, %v2772_v45 }
 0x543   : > { %2867 = vst [vmem:[%s5187_s19] sm:$0xff] %v2835_v47  ;;  %v2836_v13 = vadd.f32 %v4998_v54, %v2804_v34 }
 0x544   : > { %2870 = vst [vmem:[%s5187_s19 + $0x18] sm:$0xff] %v2838_v27  ;;  %v4207_v27 = vld [vmem:[%s4614_s21 + $0x70] sm:$0xff] }
 0x545   : > { %2868 = vst [vmem:[%s5187_s19 + $0x8] sm:$0xff] %v2836_v13 }
 0x54a   : > { %v3768_v9 = vpop.f32.mrb[68].mxu1 }
 0x54b   : > { %v2713_v36 = vadd.f32 %v3768_v9, %v5177_v55  ;;  %v2557_v5 = vpop.f32.mrb[69].mxu1 }
 0x54c   : > { %v2711_v10 = vadd.f32 %v5177_v55, %v2557_v5  ;;  %v3769_v17 = vpop.f32.mrb[70].mxu1 }
 0x54d   : > { %vm2745_vm4 = vcmp.ge.f32.partialorder %v2713_v36, 0.0  ;;  %v2777_v26 = vmul.f32 0.2, %v2713_v36  ;;  %v2714_v1 = vadd.f32 %v3769_v17, %v5177_v55  ;;  %v2560_v49 = vpop.f32.mrb[71].mxu1  ;;  %v4209_v17 = vld [vmem:[%s4614_s21 + $0x78] sm:$0xff] }
 0x54e   : > { %vm2743_vm5 = vcmp.ge.f32.partialorder %v2711_v10, 0.0  ;;  %v2775_v54 = vmul.f32 0.2, %v2711_v10  ;;  %v2712_v48 = vadd.f32 %v5177_v55, %v2560_v49  ;;  %v4210_v49 = vld [vmem:[%s4614_s21 + $0x68] sm:$0xff] }
 0x54f   : > { %v2809_v62 = vsel %vm2745_vm4, %v2713_v36, %v2777_v26  ;;  %vm2746_vm6 = vcmp.ge.f32.partialorder %v2714_v1, 0.0  ;;  %v2778_v0 = vmul.f32 0.2, %v2714_v1  ;;  %v4208_v36 = vld [vmem:[%s4614_s21 + $0x60] sm:$0xff] }
 0x550   : > { %v2841_v2 = vadd.f32 %v4199_v7, %v2809_v62  ;;  %v2807_v23 = vsel %vm2743_vm5, %v2711_v10, %v2775_v54  ;;  %vm2744_vm7 = vcmp.ge.f32.partialorder %v2712_v48, 0.0  ;;  %v2776_v56 = vmul.f32 0.2, %v2712_v48 }
 0x551   : > { %v2839_v19 = vadd.f32 %v4200_v29, %v2807_v23  ;;  %v2810_v12 = vsel %vm2746_vm6, %v2714_v1, %v2778_v0 }
 0x552   : > { %2873 = vst [vmem:[%s5187_s19 + $0x30] sm:$0xff] %v2841_v2  ;;  %v2842_v51 = vadd.f32 %v4201_v52, %v2810_v12  ;;  %v2808_v30 = vsel %vm2744_vm7, %v2712_v48, %v2776_v56 }
 0x553   : > { %2871 = vst [vmem:[%s5187_s19 + $0x20] sm:$0xff] %v2839_v19  ;;  %v2840_v11 = vadd.f32 %v4202_v4, %v2808_v30  ;;  %v4211_v30 = vld [vmem:[%s4614_s21 + $0x90] sm:$0xff] }
 0x554   : > { %2874 = vst [vmem:[%s5187_s19 + $0x38] sm:$0xff] %v2842_v51 }
 0x555   : > { %2872 = vst [vmem:[%s5187_s19 + $0x28] sm:$0xff] %v2840_v11 }
 0x55a   : > { %v3772_v3 = vpop.f32.mrb[72].mxu1 }
 0x55b   : > { %v2717_v58 = vadd.f32 %v3772_v3, %v5177_v55  ;;  %v2573_v16 = vpop.f32.mrb[73].mxu1 }
 0x55c   : > { %v2715_v57 = vadd.f32 %v5177_v55, %v2573_v16  ;;  %v3773_v60 = vpop.f32.mrb[74].mxu1 }
 0x55d   : > { %vm2749_vm8 = vcmp.ge.f32.partialorder %v2717_v58, 0.0  ;;  %v2781_v8 = vmul.f32 0.2, %v2717_v58  ;;  %v2718_v44 = vadd.f32 %v3773_v60, %v5177_v55  ;;  %v2576_v22 = vpop.f32.mrb[75].mxu1  ;;  %v4213_v60 = vld [vmem:[%s4614_s21 + $0x98] sm:$0xff] }
 0x55e   : > { %vm2747_vm9 = vcmp.ge.f32.partialorder %v2715_v57, 0.0  ;;  %v2779_v38 = vmul.f32 0.2, %v2715_v57  ;;  %v2716_v25 = vadd.f32 %v5177_v55, %v2576_v22  ;;  %v4214_v22 = vld [vmem:[%s4614_s21 + $0x88] sm:$0xff] }
 0x55f   : > { %v2813_v39 = vsel %vm2749_vm8, %v2717_v58, %v2781_v8  ;;  %vm2750_vm10 = vcmp.ge.f32.partialorder %v2718_v44, 0.0  ;;  %v2782_v43 = vmul.f32 0.2, %v2718_v44  ;;  %v4212_v58 = vld [vmem:[%s4614_s21 + $0x80] sm:$0xff] }
 0x560   : > { %v2845_v21 = vadd.f32 %v4203_v53, %v2813_v39  ;;  %v2811_v37 = vsel %vm2747_vm9, %v2715_v57, %v2779_v38  ;;  %vm2748_vm11 = vcmp.ge.f32.partialorder %v2716_v25, 0.0  ;;  %v2780_v33 = vmul.f32 0.2, %v2716_v25 }
 0x561   : > { %v2843_v41 = vadd.f32 %v4204_v42, %v2811_v37  ;;  %v2814_v18 = vsel %vm2750_vm10, %v2718_v44, %v2782_v43 }
 0x562   : > { %2877 = vst [vmem:[%s5187_s19 + $0x50] sm:$0xff] %v2845_v21  ;;  %v2846_v63 = vadd.f32 %v4205_v61, %v2814_v18  ;;  %v2812_v6 = vsel %vm2748_vm11, %v2716_v25, %v2780_v33 }
 0x563   : > { %2875 = vst [vmem:[%s5187_s19 + $0x40] sm:$0xff] %v2843_v41  ;;  %v2844_v31 = vadd.f32 %v4206_v15, %v2812_v6  ;;  %v4215_v6 = vld [vmem:[%s4614_s21 + $0xb0] sm:$0xff] }
 0x564   : > { %2878 = vst [vmem:[%s5187_s19 + $0x58] sm:$0xff] %v2846_v63 }
 0x565   : > { %2876 = vst [vmem:[%s5187_s19 + $0x48] sm:$0xff] %v2844_v31 }
 0x56a   : > { %v3776_v28 = vpop.f32.mrb[76].mxu1 }
 0x56b   : > { %v2721_v35 = vadd.f32 %v3776_v28, %v5177_v55  ;;  %v2589_v14 = vpop.f32.mrb[77].mxu1 }
 0x56c   : > { %v2719_v20 = vadd.f32 %v5177_v55, %v2589_v14  ;;  %v3777_v24 = vpop.f32.mrb[78].mxu1 }
 0x56d   : > { %vm2753_vm12 = vcmp.ge.f32.partialorder %v2721_v35, 0.0  ;;  %v2785_v50 = vmul.f32 0.2, %v2721_v35  ;;  %v2722_v46 = vadd.f32 %v3777_v24, %v5177_v55  ;;  %v2592_v32 = vpop.f32.mrb[79].mxu1  ;;  %v4217_v24 = vld [vmem:[%s4614_s21 + $0xb8] sm:$0xff] }
 0x56e   : > { %vm2751_vm13 = vcmp.ge.f32.partialorder %v2719_v20, 0.0  ;;  %v2783_v40 = vmul.f32 0.2, %v2719_v20  ;;  %v2720_v45 = vadd.f32 %v5177_v55, %v2592_v32  ;;  %v4218_v32 = vld [vmem:[%s4614_s21 + $0xa8] sm:$0xff] }
 0x56f   : > { %v2817_v47 = vsel %vm2753_vm12, %v2721_v35, %v2785_v50  ;;  %vm2754_vm14 = vcmp.ge.f32.partialorder %v2722_v46, 0.0  ;;  %v2786_v59 = vmul.f32 0.2, %v2722_v46  ;;  %v4216_v35 = vld [vmem:[%s4614_s21 + $0xa0] sm:$0xff] }
 0x570   : > { %v2849_v34 = vadd.f32 %v4207_v27, %v2817_v47  ;;  %v2815_v13 = vsel %vm2751_vm13, %v2719_v20, %v2783_v40  ;;  %vm2752_vm15 = vcmp.ge.f32.partialorder %v2720_v45, 0.0  ;;  %v2784_v9 = vmul.f32 0.2, %v2720_v45 }
 0x571   : > { %v2847_v5 = vadd.f32 %v4208_v36, %v2815_v13  ;;  %v2818_v10 = vsel %vm2754_vm14, %v2722_v46, %v2786_v59 }
 0x572   : > { %2881 = vst [vmem:[%s5187_s19 + $0x70] sm:$0xff] %v2849_v34  ;;  %v2850_v26 = vadd.f32 %v4209_v17, %v2818_v10  ;;  %v2816_v1 = vsel %vm2752_vm15, %v2720_v45, %v2784_v9 }
 0x573   : > { %2879 = vst [vmem:[%s5187_s19 + $0x60] sm:$0xff] %v2847_v5  ;;  %v2848_v54 = vadd.f32 %v4210_v49, %v2816_v1  ;;  %v4219_v1 = vld [vmem:[%s4614_s21 + $0xd0] sm:$0xff] }
 0x574   : > { %2882 = vst [vmem:[%s5187_s19 + $0x78] sm:$0xff] %v2850_v26 }
 0x575   : > { %2880 = vst [vmem:[%s5187_s19 + $0x68] sm:$0xff] %v2848_v54 }
 0x57a   : > { %v3780_v48 = vpop.f32.mrb[80].mxu1 }
 0x57b   : > { %v2725_v62 = vadd.f32 %v3780_v48, %v5177_v55  ;;  %v2605_v0 = vpop.f32.mrb[81].mxu1 }
 0x57c   : > { %v2723_v7 = vadd.f32 %v5177_v55, %v2605_v0  ;;  %v3781_v2 = vpop.f32.mrb[82].mxu1 }
 0x57d   : > { %vm2757_vm0 = vcmp.ge.f32.partialorder %v2725_v62, 0.0  ;;  %v2789_v23 = vmul.f32 0.2, %v2725_v62  ;;  %v2726_v56 = vadd.f32 %v3781_v2, %v5177_v55  ;;  %v2608_v29 = vpop.f32.mrb[83].mxu1  ;;  %v4221_v2 = vld [vmem:[%s4614_s21 + $0xd8] sm:$0xff] }
 0x57e   : > { %vm2755_vm1 = vcmp.ge.f32.partialorder %v2723_v7, 0.0  ;;  %v2787_v19 = vmul.f32 0.2, %v2723_v7  ;;  %v2724_v12 = vadd.f32 %v5177_v55, %v2608_v29  ;;  %v4222_v29 = vld [vmem:[%s4614_s21 + $0xc8] sm:$0xff] }
 0x57f   : > { %v2821_v52 = vsel %vm2757_vm0, %v2725_v62, %v2789_v23  ;;  %vm2758_vm2 = vcmp.ge.f32.partialorder %v2726_v56, 0.0  ;;  %v2790_v51 = vmul.f32 0.2, %v2726_v56  ;;  %v4220_v62 = vld [vmem:[%s4614_s21 + $0xc0] sm:$0xff] }
 0x580   : > { %v2853_v4 = vadd.f32 %v4211_v30, %v2821_v52  ;;  %v2819_v11 = vsel %vm2755_vm1, %v2723_v7, %v2787_v19  ;;  %vm2756_vm3 = vcmp.ge.f32.partialorder %v2724_v12, 0.0  ;;  %v2788_v3 = vmul.f32 0.2, %v2724_v12 }
 0x581   : > { %v2851_v16 = vadd.f32 %v4212_v58, %v2819_v11  ;;  %v2822_v57 = vsel %vm2758_vm2, %v2726_v56, %v2790_v51 }
 0x582   : > { %2885 = vst [vmem:[%s5187_s19 + $0x90] sm:$0xff] %v2853_v4  ;;  %v2854_v8 = vadd.f32 %v4213_v60, %v2822_v57  ;;  %v2820_v44 = vsel %vm2756_vm3, %v2724_v12, %v2788_v3 }
 0x583   : > { %2883 = vst [vmem:[%s5187_s19 + $0x80] sm:$0xff] %v2851_v16  ;;  %v2852_v38 = vadd.f32 %v4214_v22, %v2820_v44  ;;  %v4223_v44 = vld [vmem:[%s4614_s21 + $0xf0] sm:$0xff] }
 0x584   : > { %2886 = vst [vmem:[%s5187_s19 + $0x98] sm:$0xff] %v2854_v8 }
 0x585   : > { %2884 = vst [vmem:[%s5187_s19 + $0x88] sm:$0xff] %v2852_v38 }
 0x58a   : > { %v3784_v25 = vpop.f32.mrb[84].mxu1 }
 0x58b   : > { %v2729_v39 = vadd.f32 %v3784_v25, %v5177_v55  ;;  %v2621_v43 = vpop.f32.mrb[85].mxu1 }
 0x58c   : > { %v2727_v53 = vadd.f32 %v5177_v55, %v2621_v43  ;;  %v3785_v21 = vpop.f32.mrb[86].mxu1 }
 0x58d   : > { %vm2761_vm4 = vcmp.ge.f32.partialorder %v2729_v39, 0.0  ;;  %v2793_v37 = vmul.f32 0.2, %v2729_v39  ;;  %v2730_v33 = vadd.f32 %v3785_v21, %v5177_v55  ;;  %v2624_v42 = vpop.f32.mrb[87].mxu1 }
 0x58e   : > { %vm2759_vm5 = vcmp.ge.f32.partialorder %v2727_v53, 0.0  ;;  %v2791_v41 = vmul.f32 0.2, %v2727_v53  ;;  %v2728_v18 = vadd.f32 %v5177_v55, %v2624_v42 }
 0x58f   : > { %v2825_v61 = vsel %vm2761_vm4, %v2729_v39, %v2793_v37  ;;  %vm2762_vm6 = vcmp.ge.f32.partialorder %v2730_v33, 0.0  ;;  %v2794_v63 = vmul.f32 0.2, %v2730_v33  ;;  %v4224_v39 = vld [vmem:[%s4614_s21 + $0xe0] sm:$0xff] }
 0x590   : > { %v2857_v15 = vadd.f32 %v4215_v6, %v2825_v61  ;;  %v2823_v31 = vsel %vm2759_vm5, %v2727_v53, %v2791_v41  ;;  %vm2760_vm7 = vcmp.ge.f32.partialorder %v2728_v18, 0.0  ;;  %v2792_v28 = vmul.f32 0.2, %v2728_v18 }
 0x591   : > { %v2855_v14 = vadd.f32 %v4216_v35, %v2823_v31  ;;  %v2826_v20 = vsel %vm2762_vm6, %v2730_v33, %v2794_v63  ;;  %v4226_v33 = vld [vmem:[%s4614_s21 + $0xe8] sm:$0xff] }
 0x592   : > { %2889 = vst [vmem:[%s5187_s19 + $0xb0] sm:$0xff] %v2857_v15  ;;  %v2858_v50 = vadd.f32 %v4217_v24, %v2826_v20  ;;  %v2824_v46 = vsel %vm2760_vm7, %v2728_v18, %v2792_v28 }
 0x593   : > { %2887 = vst [vmem:[%s5187_s19 + $0xa0] sm:$0xff] %v2855_v14  ;;  %v2856_v40 = vadd.f32 %v4218_v32, %v2824_v46 }
 0x594   : > { %2890 = vst [vmem:[%s5187_s19 + $0xb8] sm:$0xff] %v2858_v50 }
 0x595   : > { %2888 = vst [vmem:[%s5187_s19 + $0xa8] sm:$0xff] %v2856_v40 }
 0x59a   : > { %v3788_v45 = vpop.f32.mrb[88].mxu1 }
 0x59b   : > { %v2733_v47 = vadd.f32 %v3788_v45, %v5177_v55  ;;  %v2637_v59 = vpop.f32.mrb[89].mxu1 }
 0x59c   : > { %v2731_v27 = vadd.f32 %v5177_v55, %v2637_v59  ;;  %v3789_v34 = vpop.f32.mrb[90].mxu1 }
 0x59d   : > { %vm2765_vm8 = vcmp.ge.f32.partialorder %v2733_v47, 0.0  ;;  %v2797_v13 = vmul.f32 0.2, %v2733_v47  ;;  %v2734_v9 = vadd.f32 %v3789_v34, %v5177_v55  ;;  %v2640_v36 = vpop.f32.mrb[91].mxu1 }
 0x59e   : > { %vm2763_vm9 = vcmp.ge.f32.partialorder %v2731_v27, 0.0  ;;  %v2795_v5 = vmul.f32 0.2, %v2731_v27  ;;  %v2732_v10 = vadd.f32 %v5177_v55, %v2640_v36 }
 0x59f   : > { %v2829_v17 = vsel %vm2765_vm8, %v2733_v47, %v2797_v13  ;;  %vm2766_vm10 = vcmp.ge.f32.partialorder %v2734_v9, 0.0  ;;  %v2798_v26 = vmul.f32 0.2, %v2734_v9 }
 0x5a0   : > { %v2861_v49 = vadd.f32 %v4219_v1, %v2829_v17  ;;  %v2827_v54 = vsel %vm2763_vm9, %v2731_v27, %v2795_v5  ;;  %vm2764_vm11 = vcmp.ge.f32.partialorder %v2732_v10, 0.0  ;;  %v2796_v48 = vmul.f32 0.2, %v2732_v10 }
 0x5a1   : > { %v2859_v0 = vadd.f32 %v4220_v62, %v2827_v54  ;;  %v2830_v7 = vsel %vm2766_vm10, %v2734_v9, %v2798_v26 }
 0x5a2   : > { %2893 = vst [vmem:[%s5187_s19 + $0xd0] sm:$0xff] %v2861_v49  ;;  %v2862_v23 = vadd.f32 %v4221_v2, %v2830_v7  ;;  %v2828_v56 = vsel %vm2764_vm11, %v2732_v10, %v2796_v48 }
 0x5a3   : > { %2891 = vst [vmem:[%s5187_s19 + $0xc0] sm:$0xff] %v2859_v0  ;;  %v2860_v19 = vadd.f32 %v4222_v29, %v2828_v56 }
 0x5a4   : > { %2894 = vst [vmem:[%s5187_s19 + $0xd8] sm:$0xff] %v2862_v23 }
 0x5a5   : > { %2892 = vst [vmem:[%s5187_s19 + $0xc8] sm:$0xff] %v2860_v19 }
 0x5aa   : > { %v3792_v12 = vpop.f32.mrb[92].mxu1 }
 0x5ab   : > { %v2737_v52 = vadd.f32 %v3792_v12, %v5177_v55  ;;  %v2653_v51 = vpop.f32.mrb[93].mxu1 }
 0x5ac   : > { %v2735_v30 = vadd.f32 %v5177_v55, %v2653_v51  ;;  %v3793_v4 = vpop.f32.mrb[94].mxu1 }
 0x5ad   : > { %vm2769_vm12 = vcmp.ge.f32.partialorder %v2737_v52, 0.0  ;;  %v2801_v11 = vmul.f32 0.2, %v2737_v52  ;;  %v2738_v3 = vadd.f32 %v3793_v4, %v5177_v55  ;;  %v2656_v58 = vpop.f32.mrb[95].mxu1 }
 0x5ae   : > { %vm2767_vm13 = vcmp.ge.f32.partialorder %v2735_v30, 0.0  ;;  %v2799_v16 = vmul.f32 0.2, %v2735_v30  ;;  %v2736_v57 = vadd.f32 %v5177_v55, %v2656_v58  ;;  %v4225_v55 = vld [vmem:[%s4614_s21 + $0xf8] sm:$0xff] }
 0x5af   : > { %v2833_v60 = vsel %vm2769_vm12, %v2737_v52, %v2801_v11  ;;  %vm2770_vm14 = vcmp.ge.f32.partialorder %v2738_v3, 0.0  ;;  %v2802_v8 = vmul.f32 0.2, %v2738_v3 }
 0x5b0   : > { %v2865_v22 = vadd.f32 %v4223_v44, %v2833_v60  ;;  %v2831_v38 = vsel %vm2767_vm13, %v2735_v30, %v2799_v16  ;;  %vm2768_vm15 = vcmp.ge.f32.partialorder %v2736_v57, 0.0  ;;  %v2800_v25 = vmul.f32 0.2, %v2736_v57 }
 0x5b1   : > { %v2863_v43 = vadd.f32 %v4224_v39, %v2831_v38  ;;  %v2834_v53 = vsel %vm2770_vm14, %v2738_v3, %v2802_v8 }
 0x5b2   : > { %2897 = vst [vmem:[%s5187_s19 + $0xf0] sm:$0xff] %v2865_v22  ;;  %v2866_v21 = vadd.f32 %v4225_v55, %v2834_v53  ;;  %v2832_v37 = vsel %vm2768_vm15, %v2736_v57, %v2800_v25 }
 0x5b3   : > { %2895 = vst [vmem:[%s5187_s19 + $0xe0] sm:$0xff] %v2863_v43  ;;  %v2864_v42 = vadd.f32 %v4226_v33, %v2832_v37 }
 0x5b4   : > { %2898 = vst [vmem:[%s5187_s19 + $0xf8] sm:$0xff] %v2866_v21 }
 0x5b5   : > { %2896 = vst [vmem:[%s5187_s19 + $0xe8] sm:$0xff] %v2864_v42 }
 0x5b6   : > { %4326 = shalt.err (!%p4323_p6)
}
 0x5b7   : > { %s4327_s21 = scalar_lea.hbm %s5280_s18, 4096  ;;  %s4331_s19 = scalar_lea.hbm %s5337_s7, 8192 }
 0x5b8   : > { %p4328_p10 = scmp.ne.s32.totalorder %s5280_s18, %s4327_s21  ;;  %p4332_p8 = scmp.lt.u32.totalorder %s5280_s18, %s5337_s7 }
 0x5b9   : > { %p4333_p11 = scmp.lt.u32.totalorder %s4331_s19, %s4327_s21  ;;  %p4335_p1 = scmp.lt.u32.totalorder %s4327_s21, %s5280_s18 }
 0x5ba   : > { %p4329_p4 = pnand %p4328_p10, %p5395_p3 }
 0x5bb   : > { %p4334_p0 = por %p4333_p11, %p4332_p8 }
 0x5bc   : > { %p4330_p5 = pneg %p4329_p4 }
 0x5bd   : > { %p4336_p7 = por %p4335_p1, %p4334_p0 }
 0x5bf   : > { %p4337_p9 = pnand %p4336_p7, %p4330_p5 }
 0x5c1   : > { %4340 = shalt.err (!%p4337_p9)
}
 0x5c2   : > { %s4394_s14 = smov 128   ;;  %s4395_s9 = smov 8  }
 0x5c3   : > { %3980 = dma.vmem_to_hbm [thread:$0]  (%p5395_p3), %s5282_s12, 4096, %s5280_s18, %s2900_s30, %s4394_s14, %s4394_s14, %s4395_s9  }
 0x5c4 PF: > { %s2928_s20 = sand.u32 1, %s4371_s24   ;;  %p5396_p12 = scmp.ne.s32.totalorder %s5353_s8, 0 }
 0x5c5   : > { %p5397_p2 = scmp.ge.s32.totalorder %s4383_s27, 2  ;;  %s2929_s11 = scalar_lea.sflag [#allocation4], %s2928_s20 }
 0x5c7   : > { %p3994_p13 = pnand %p5397_p2, %p5396_p12 }
 0x5c9   : > { %4366 = dma.done.wait (!%p3994_p13), %s2929_s11, 4096  }
 0x5ca   : > { %4368 = vsyncadd (!%p3994_p13), %s2929_s11, 4294963200  ;;  %p21_p6 = scmp.ge.s32.totalorder %s4546_s13, 4   ;;  %s5398_s24 = smov %s4375_s25 }
 0x5cb   : > { %s5399_s25 = smov %s4379_s26  ;;  %s5400_s26 = smov %s4562_s17 }
 0x5cc   : > { %s5401_s27 = smov %s4546_s13  ;;  %23 = sbr.rel (!%p21_p6) target bundleno = 6 (0x6), region = 109 }
 0x5d3   :  { %2934 = vsyncpa [#allocation3], 1 }
 0x5d4   :  { %2936 = vsyncpa [#allocation3 + $0x1], 1 }
 0x5d5   :  { %2937 = vsyncpa [#allocation6], 1 }
 0x5d6   :  { %2938 = vsyncpa [#allocation4], 1 }
 0x5d7   :  { %2940 = vsyncpa [#allocation4 + $0x1], 1 }

</bundles_post_ra>
